<compile_context>
chip_gen: v5e
topology: v5e:2x2
jax: 0.10.0
libtpu: 0.0.40
codegen_flags: <defaults>
</compile_context>

<pallas_src>
import jax
import jax.numpy as jnp
from jax.experimental import pallas as pl
from jax.experimental.pallas import tpu as pltpu

_VMEM_LIMIT = 48 * 1024 * 1024     # ~15 MB realistic peak at tile_b=64; 48 MB is safe on all gens
_TILE_B_CAP = 64                   # images per grid block


def _cdiv(a, b):
    return -(-a // b)


def _pick_batch_tiling(batch, cap=_TILE_B_CAP):
    """Batch tiling with >= 2 blocks whenever batch > 1 (v7x has 2 TensorCores)."""
    nblk = max(2 if batch > 1 else 1, _cdiv(batch, cap))
    tile = _cdiv(batch, nblk)
    nblk = _cdiv(batch, tile)
    return tile, nblk, tile * nblk


# ------------------------------ Pallas kernels --------------------------------

def _fused_conv_kernel(p1_ref, w1_ref, w2_ref, y2_ref, sum_ref, sq_ref):
    """conv1(1->64,4,2,1)+LeakyReLU -> conv2(64->128,4,2,1) + BN partial stats.

    p1_ref : (TB, 4, 64, 16) bf16  conv1 im2col patches, parity ordered: group
             g = pi*2+pj holds the patch for conv2-padded position
             (h, w) = (2r+pi, 2c+pj), rc = r*8+c (zero rows at the pad border
             h,w in {0,15} and for zero-padded batch rows).
    w1_ref : (16, 64)   bf16  conv1 weight, (kh,kw) x cout.
    w2_ref : (4, 64, 512) bf16 conv2 weight: [pi*2+pj][cin, (di*2+dj)*128+cout]
             = w2_torch[cout, cin, 2*di+pi, 2*dj+pj].
    y2_ref : (TB, 7, 7, 128) bf16  pre-BN conv2 activations.
    sum/sq : (1, 1, 1, 128)  f32   per-tile channel sum / sum-of-squares.
    """
    tb = p1_ref.shape[0]
    acc = jnp.zeros((tb, 7, 7, 128), jnp.float32)
    for g in range(4):                                        # parity group (pi, pj)
        p = p1_ref[:, g].reshape(tb * 64, 16)
        y1 = jnp.dot(p, w1_ref[...], preferred_element_type=jnp.float32)
        y1 = jnp.where(y1 > 0, y1, 0.2 * y1).astype(jnp.bfloat16)
        r = jnp.dot(y1, w2_ref[g], preferred_element_type=jnp.float32)
        r = r.reshape(tb, 8, 8, 512)
        for di in range(2):                                   # tap shift (di, dj)
            for dj in range(2):
                c0 = (di * 2 + dj) * 128
                acc = acc + r[:, di:di + 7, dj:dj + 7, c0:c0 + 128]
    y2_ref[...] = acc.astype(jnp.bfloat16)
    # Per-tile partial BatchNorm statistics (f32, reduced across tiles outside),
    # so the batch stats stay exact under batch tiling and the grid stays parallel.
    s = jnp.sum(jnp.sum(acc, axis=2, keepdims=True), axis=1, keepdims=True)
    sum_ref[...] = jnp.sum(s, axis=0, keepdims=True)
    q = acc * acc
    q = jnp.sum(jnp.sum(q, axis=2, keepdims=True), axis=1, keepdims=True)
    sq_ref[...] = jnp.sum(q, axis=0, keepdims=True)


def _bn_lrelu_head_kernel(y2_ref, scale_ref, shift_ref, w3_ref, o_ref):
    """BatchNorm(apply) + LeakyReLU(0.2) + Conv2d(128,1,7,valid) + Sigmoid."""
    z = y2_ref[...].astype(jnp.float32) * scale_ref[...] + shift_ref[...]
    z = jnp.where(z > 0, z, 0.2 * z)
    s = z * w3_ref[...]                                       # (TB, 7, 7, 128)
    s = jnp.sum(s, axis=2, keepdims=True)                     # (TB, 7, 1, 128)
    s = jnp.sum(s, axis=1, keepdims=True)                     # (TB, 1, 1, 128)
    logit = jnp.sum(s, axis=3, keepdims=True)                 # (TB, 1, 1, 1)
    o_ref[...] = jax.nn.sigmoid(logit)


# ---------------------- XLA-side (tiny) data preparation -----------------------

def _prep_patches_conv1(x_nchw, b_pad):
    """(B,1,28,28) -> (b_pad,4,64,16) bf16 conv1 patches in parity-padded order."""
    b = x_nchw.shape[0]
    x = x_nchw[:, 0]                                          # (B, 28, 28)
    xp = jnp.pad(x, ((0, 0), (1, 1), (1, 1)))                 # conv1 pad = 1
    cols = [xp[:, i:i + 28:2, j:j + 28:2]                     # stride 2, k = 4
            for i in range(4) for j in range(4)]
    p = jnp.stack(cols, axis=-1)                              # (B, 14, 14, 16)
    # conv2's zero padding of y1 (border) + batch padding, then parity split.
    p = jnp.pad(p, ((0, b_pad - b), (1, 1), (1, 1), (0, 0)))  # (b_pad, 16, 16, 16)
    p = p.reshape(b_pad, 8, 2, 8, 2, 16)
    p = jnp.transpose(p, (0, 2, 4, 1, 3, 5))                  # (b_pad, pi, pj, r, c, 16)
    return p.reshape(b_pad, 4, 64, 16).astype(jnp.bfloat16)


def _prep_w1(w1):
    # OIHW (64,1,4,4) -> (16, 64) with row order (kh, kw).
    return jnp.transpose(w1, (2, 3, 1, 0)).reshape(16, 64).astype(jnp.bfloat16)


def _prep_w2(w2):
    # OIHW (128,64,4,4) -> (4, 64, 512): [pi*2+pj][cin, (di*2+dj)*128 + cout].
    w = jnp.transpose(w2, (1, 2, 3, 0))                       # (cin, kh, kw, cout)
    w = w.reshape(64, 2, 2, 2, 2, 128)                        # (cin, di, pi, dj, pj, cout)
    w = jnp.transpose(w, (2, 4, 0, 1, 3, 5))                  # (pi, pj, cin, di, dj, cout)
    return w.reshape(4, 64, 512).astype(jnp.bfloat16)


def _prep_w3(w3):
    # (1,128,7,7) -> (1, 7, 7, 128) f32, matching y2's (b, o, p, ch) layout.
    return jnp.transpose(w3[0], (1, 2, 0)).reshape(1, 7, 7, 128)


# -------------------------------- forward pass ----------------------------------

def discriminator_forward(x, params):
    """x: (B, 1, 28, 28) float32 NCHW (as in PyTorch). Returns (B, 1) in (0, 1)."""
    batch = x.shape[0]
    eps = 1e-5
    tile_b, nblk, b_pad = _pick_batch_tiling(batch)

    p1 = _prep_patches_conv1(x, b_pad)
    w1 = _prep_w1(params["w1"])
    w2 = _prep_w2(params["w2"])
    w3 = _prep_w3(params["w3"])

    y2, s1, s2 = pl.pallas_call(
        _fused_conv_kernel,
        out_shape=(jax.ShapeDtypeStruct((b_pad, 7, 7, 128), jnp.bfloat16),
                   jax.ShapeDtypeStruct((nblk, 1, 1, 128), jnp.float32),
                   jax.ShapeDtypeStruct((nblk, 1, 1, 128), jnp.float32)),
        grid=(nblk,),
        in_specs=[pl.BlockSpec((tile_b, 4, 64, 16), lambda i: (i, 0, 0, 0)),
                  pl.BlockSpec((16, 64), lambda i: (0, 0)),
                  pl.BlockSpec((4, 64, 512), lambda i: (0, 0, 0))],
        out_specs=(pl.BlockSpec((tile_b, 7, 7, 128), lambda i: (i, 0, 0, 0)),
                   pl.BlockSpec((1, 1, 1, 128), lambda i: (i, 0, 0, 0)),
                   pl.BlockSpec((1, 1, 1, 128), lambda i: (i, 0, 0, 0))),
        compiler_params=pltpu.CompilerParams(
            dimension_semantics=("parallel",),
            vmem_limit_bytes=_VMEM_LIMIT),
    )(p1, w1, w2)

    # BatchNorm2d(128) training-mode batch statistics (biased var, eps=1e-5).
    # Zero-padded batch rows contribute exactly 0 to both sums (no conv bias),
    # so dividing by the real element count keeps the stats exact.
    m2 = batch * 49
    ch_sum = jnp.sum(s1, axis=(0, 1, 2))
    ch_sq = jnp.sum(s2, axis=(0, 1, 2))
    mean = ch_sum / m2
    var = jnp.maximum(ch_sq / m2 - mean * mean, 0.0)          # clamp f32 cancellation
    inv = jax.lax.rsqrt(var + eps)
    scale = (params["gamma"] * inv).reshape(1, 1, 1, 128)
    shift = (params["beta"] - mean * params["gamma"] * inv).reshape(1, 1, 1, 128)

    out = pl.pallas_call(
        _bn_lrelu_head_kernel,
        out_shape=jax.ShapeDtypeStruct((b_pad, 1, 1, 1), jnp.float32),
        grid=(nblk,),
        in_specs=[pl.BlockSpec((tile_b, 7, 7, 128), lambda i: (i, 0, 0, 0)),
                  pl.BlockSpec((1, 1, 1, 128), lambda i: (0, 0, 0, 0)),
                  pl.BlockSpec((1, 1, 1, 128), lambda i: (0, 0, 0, 0)),
                  pl.BlockSpec((1, 7, 7, 128), lambda i: (0, 0, 0, 0))],
        out_specs=pl.BlockSpec((tile_b, 1, 1, 1), lambda i: (i, 0, 0, 0)),
        compiler_params=pltpu.CompilerParams(
            dimension_semantics=("parallel",),
            vmem_limit_bytes=_VMEM_LIMIT),
    )(y2, scale, shift, w3)
    return out.reshape(b_pad, 1)[:batch]


# --------------------------- pure-JAX reference --------------------------------

def _reference_forward(x, params):
    def conv(a, w, stride, pad):
        dn = jax.lax.conv_dimension_numbers(a.shape, w.shape, ("NCHW", "OIHW", "NCHW"))
        return jax.lax.conv_general_dilated(
            a, w, (stride, stride), [(pad, pad), (pad, pad)],
            dimension_numbers=dn, precision=jax.lax.Precision.HIGHEST)

    y = conv(x, params["w1"], 2, 1)
    y = jnp.where(y > 0, y, 0.2 * y)
    y = conv(y, params["w2"], 2, 1)
    mean = jnp.mean(y, axis=(0, 2, 3), keepdims=True)
    var = jnp.mean((y - mean) ** 2, axis=(0, 2, 3), keepdims=True)
    y = (y - mean) * jax.lax.rsqrt(var + 1e-5)
    y = y * params["gamma"].reshape(1, -1, 1, 1) + params["beta"].reshape(1, -1, 1, 1)
    y = jnp.where(y > 0, y, 0.2 * y)
    y = conv(y, params["w3"], 1, 0)
    return jax.nn.sigmoid(y).reshape(-1, 1)


# ------------------------------------ main --------------------------------------

if __name__ == "__main__":
    key = jax.random.PRNGKey(0)
    k1, k2, k3, kg, kb, kx = jax.random.split(key, 6)

    # Deterministic synthetic parameters (shapes match nn.Conv2d / nn.BatchNorm2d).
    params = {
        "w1": jax.random.normal(k1, (64, 1, 4, 4), jnp.float32) * 0.05,
        "w2": jax.random.normal(k2, (128, 64, 4, 4), jnp.float32) * 0.05,
        "w3": jax.random.normal(k3, (1, 128, 7, 7), jnp.float32) * 0.05,
        "gamma": 1.0 + 0.1 * jax.random.normal(kg, (128,), jnp.float32),
        "beta": 0.1 * jax.random.normal(kb, (128,), jnp.float32),
    }

    x = jax.random.normal(kx, (2, 1, 28, 28), jnp.float32)    # NCHW, like PyTorch

    out = jax.block_until_ready(jax.jit(discriminator_forward)(x, params))
    assert out.shape == (2, 1)

    ref = jax.block_until_ready(jax.jit(_reference_forward)(x, params))
    # bf16 conv path (conv1 + conv2 inputs, bf16 intermediates) vs all-f32 HIGHEST ref.
    assert jnp.max(jnp.abs(out - ref)) < 2.5e-2, "Pallas output mismatch vs reference"

    print("KERNEL_OK")
</pallas_src>

<mosaic_0001>
module attributes {stable_mosaic.version = 11 : i64} {
  func.func @_fused_conv_kernel(%arg0: i32, %arg1: memref<1x4x64x16xbf16, #tpu.memory_space<vmem>>, %arg2: memref<16x64xbf16, #tpu.memory_space<vmem>>, %arg3: memref<4x64x512xbf16, #tpu.memory_space<vmem>>, %arg4: memref<1x7x7x128xbf16, #tpu.memory_space<vmem>>, %arg5: memref<1x1x1x128xf32, #tpu.memory_space<vmem>>, %arg6: memref<1x1x1x128xf32, #tpu.memory_space<vmem>>) attributes {dimension_semantics = [#tpu.dimension_semantics<parallel>], iteration_bounds = array<i64: 2>, scalar_prefetch = 0 : i64, scratch_operands = 0 : i64, tpu.core_type = #tpu.core_type<tc>, window_params = [{transform_indices = @transform_0, window_bounds = array<i64: 1, 4, 64, 16>}, {pipeline_mode = #tpu.pipeline_mode<synchronous>, transform_indices = @transform_1, window_bounds = array<i64: 16, 64>}, {pipeline_mode = #tpu.pipeline_mode<synchronous>, transform_indices = @transform_2, window_bounds = array<i64: 4, 64, 512>}, {transform_indices = @transform_3, window_bounds = array<i64: 1, 7, 7, 128>}, {transform_indices = @transform_4, window_bounds = array<i64: 1, 1, 1, 128>}, {transform_indices = @transform_5, window_bounds = array<i64: 1, 1, 1, 128>}]} {
    %cst = arith.constant 0.000000e+00 : f32
    %0 = vector.broadcast %cst : f32 to vector<1x7x7x128xf32>
    %c0 = arith.constant 0 : index
    %c0_0 = arith.constant 0 : index
    %c0_1 = arith.constant 0 : index
    %c0_2 = arith.constant 0 : index
    %1 = vector.load %arg1[%c0, %c0_0, %c0_1, %c0_2] : memref<1x4x64x16xbf16, #tpu.memory_space<vmem>>, vector<1x1x64x16xbf16>
    %2 = vector.shape_cast %1 : vector<1x1x64x16xbf16> to vector<1x64x16xbf16>
    %3 = vector.shape_cast %2 : vector<1x64x16xbf16> to vector<64x16xbf16>
    %c0_3 = arith.constant 0 : index
    %c0_4 = arith.constant 0 : index
    %4 = vector.load %arg2[%c0_3, %c0_4] : memref<16x64xbf16, #tpu.memory_space<vmem>>, vector<16x64xbf16>
    %cst_5 = arith.constant dense<0.000000e+00> : vector<64x64xf32>
    %5 = tpu.matmul %3, %4, %cst_5 {dimension_numbers = #tpu.dot_dimension_numbers<[1], [0], [0], [1], [0, 0, 1, 1], [], []>} : vector<64x16xbf16>, vector<16x64xbf16>, vector<64x64xf32> -> vector<64x64xf32>
    %cst_6 = arith.constant 0.000000e+00 : f32
    %6 = vector.broadcast %cst_6 : f32 to vector<64x64xf32>
    %7 = arith.cmpf ogt, %5, %6 : vector<64x64xf32>
    %cst_7 = arith.constant 2.000000e-01 : f32
    %8 = vector.broadcast %cst_7 : f32 to vector<64x64xf32>
    %9 = arith.mulf %8, %5 : vector<64x64xf32>
    %10 = arith.select %7, %5, %9 : vector<64x64xi1>, vector<64x64xf32>
    %11 = arith.truncf %10 : vector<64x64xf32> to vector<64x64xbf16>
    %c0_8 = arith.constant 0 : index
    %c0_9 = arith.constant 0 : index
    %c0_10 = arith.constant 0 : index
    %12 = vector.load %arg3[%c0_8, %c0_9, %c0_10] : memref<4x64x512xbf16, #tpu.memory_space<vmem>>, vector<1x64x512xbf16>
    %13 = vector.shape_cast %12 : vector<1x64x512xbf16> to vector<64x512xbf16>
    %cst_11 = arith.constant dense<0.000000e+00> : vector<64x512xf32>
    %14 = tpu.matmul %11, %13, %cst_11 {dimension_numbers = #tpu.dot_dimension_numbers<[1], [0], [0], [1], [0, 0, 1, 1], [], []>} : vector<64x64xbf16>, vector<64x512xbf16>, vector<64x512xf32> -> vector<64x512xf32>
    %15 = vector.shape_cast %14 : vector<64x512xf32> to vector<1x8x8x512xf32>
    %16 = vector.extract_strided_slice %15 {offsets = [0, 0, 0, 0], sizes = [1, 7, 7, 128], strides = [1, 1, 1, 1]} : vector<1x8x8x512xf32> to vector<1x7x7x128xf32>
    %17 = arith.addf %0, %16 : vector<1x7x7x128xf32>
    %18 = vector.extract_strided_slice %15 {offsets = [0, 0, 1, 128], sizes = [1, 7, 7, 128], strides = [1, 1, 1, 1]} : vector<1x8x8x512xf32> to vector<1x7x7x128xf32>
    %19 = arith.addf %17, %18 : vector<1x7x7x128xf32>
    %20 = vector.extract_strided_slice %15 {offsets = [0, 1, 0, 256], sizes = [1, 7, 7, 128], strides = [1, 1, 1, 1]} : vector<1x8x8x512xf32> to vector<1x7x7x128xf32>
    %21 = arith.addf %19, %20 : vector<1x7x7x128xf32>
    %22 = vector.extract_strided_slice %15 {offsets = [0, 1, 1, 384], sizes = [1, 7, 7, 128], strides = [1, 1, 1, 1]} : vector<1x8x8x512xf32> to vector<1x7x7x128xf32>
    %23 = arith.addf %21, %22 : vector<1x7x7x128xf32>
    %c0_12 = arith.constant 0 : index
    %c1 = arith.constant 1 : index
    %c0_13 = arith.constant 0 : index
    %c0_14 = arith.constant 0 : index
    %24 = vector.load %arg1[%c0_12, %c1, %c0_13, %c0_14] : memref<1x4x64x16xbf16, #tpu.memory_space<vmem>>, vector<1x1x64x16xbf16>
    %25 = vector.shape_cast %24 : vector<1x1x64x16xbf16> to vector<1x64x16xbf16>
    %26 = vector.shape_cast %25 : vector<1x64x16xbf16> to vector<64x16xbf16>
    %c0_15 = arith.constant 0 : index
    %c0_16 = arith.constant 0 : index
    %27 = vector.load %arg2[%c0_15, %c0_16] : memref<16x64xbf16, #tpu.memory_space<vmem>>, vector<16x64xbf16>
    %cst_17 = arith.constant dense<0.000000e+00> : vector<64x64xf32>
    %28 = tpu.matmul %26, %27, %cst_17 {dimension_numbers = #tpu.dot_dimension_numbers<[1], [0], [0], [1], [0, 0, 1, 1], [], []>} : vector<64x16xbf16>, vector<16x64xbf16>, vector<64x64xf32> -> vector<64x64xf32>
    %cst_18 = arith.constant 0.000000e+00 : f32
    %29 = vector.broadcast %cst_18 : f32 to vector<64x64xf32>
    %30 = arith.cmpf ogt, %28, %29 : vector<64x64xf32>
    %cst_19 = arith.constant 2.000000e-01 : f32
    %31 = vector.broadcast %cst_19 : f32 to vector<64x64xf32>
    %32 = arith.mulf %31, %28 : vector<64x64xf32>
    %33 = arith.select %30, %28, %32 : vector<64x64xi1>, vector<64x64xf32>
    %34 = arith.truncf %33 : vector<64x64xf32> to vector<64x64xbf16>
    %c1_20 = arith.constant 1 : index
    %c0_21 = arith.constant 0 : index
    %c0_22 = arith.constant 0 : index
    %35 = vector.load %arg3[%c1_20, %c0_21, %c0_22] : memref<4x64x512xbf16, #tpu.memory_space<vmem>>, vector<1x64x512xbf16>
    %36 = vector.shape_cast %35 : vector<1x64x512xbf16> to vector<64x512xbf16>
    %cst_23 = arith.constant dense<0.000000e+00> : vector<64x512xf32>
    %37 = tpu.matmul %34, %36, %cst_23 {dimension_numbers = #tpu.dot_dimension_numbers<[1], [0], [0], [1], [0, 0, 1, 1], [], []>} : vector<64x64xbf16>, vector<64x512xbf16>, vector<64x512xf32> -> vector<64x512xf32>
    %38 = vector.shape_cast %37 : vector<64x512xf32> to vector<1x8x8x512xf32>
    %39 = vector.extract_strided_slice %38 {offsets = [0, 0, 0, 0], sizes = [1, 7, 7, 128], strides = [1, 1, 1, 1]} : vector<1x8x8x512xf32> to vector<1x7x7x128xf32>
    %40 = arith.addf %23, %39 : vector<1x7x7x128xf32>
    %41 = vector.extract_strided_slice %38 {offsets = [0, 0, 1, 128], sizes = [1, 7, 7, 128], strides = [1, 1, 1, 1]} : vector<1x8x8x512xf32> to vector<1x7x7x128xf32>
    %42 = arith.addf %40, %41 : vector<1x7x7x128xf32>
    %43 = vector.extract_strided_slice %38 {offsets = [0, 1, 0, 256], sizes = [1, 7, 7, 128], strides = [1, 1, 1, 1]} : vector<1x8x8x512xf32> to vector<1x7x7x128xf32>
    %44 = arith.addf %42, %43 : vector<1x7x7x128xf32>
    %45 = vector.extract_strided_slice %38 {offsets = [0, 1, 1, 384], sizes = [1, 7, 7, 128], strides = [1, 1, 1, 1]} : vector<1x8x8x512xf32> to vector<1x7x7x128xf32>
    %46 = arith.addf %44, %45 : vector<1x7x7x128xf32>
    %c0_24 = arith.constant 0 : index
    %c2 = arith.constant 2 : index
    %c0_25 = arith.constant 0 : index
    %c0_26 = arith.constant 0 : index
    %47 = vector.load %arg1[%c0_24, %c2, %c0_25, %c0_26] : memref<1x4x64x16xbf16, #tpu.memory_space<vmem>>, vector<1x1x64x16xbf16>
    %48 = vector.shape_cast %47 : vector<1x1x64x16xbf16> to vector<1x64x16xbf16>
    %49 = vector.shape_cast %48 : vector<1x64x16xbf16> to vector<64x16xbf16>
    %c0_27 = arith.constant 0 : index
    %c0_28 = arith.constant 0 : index
    %50 = vector.load %arg2[%c0_27, %c0_28] : memref<16x64xbf16, #tpu.memory_space<vmem>>, vector<16x64xbf16>
    %cst_29 = arith.constant dense<0.000000e+00> : vector<64x64xf32>
    %51 = tpu.matmul %49, %50, %cst_29 {dimension_numbers = #tpu.dot_dimension_numbers<[1], [0], [0], [1], [0, 0, 1, 1], [], []>} : vector<64x16xbf16>, vector<16x64xbf16>, vector<64x64xf32> -> vector<64x64xf32>
    %cst_30 = arith.constant 0.000000e+00 : f32
    %52 = vector.broadcast %cst_30 : f32 to vector<64x64xf32>
    %53 = arith.cmpf ogt, %51, %52 : vector<64x64xf32>
    %cst_31 = arith.constant 2.000000e-01 : f32
    %54 = vector.broadcast %cst_31 : f32 to vector<64x64xf32>
    %55 = arith.mulf %54, %51 : vector<64x64xf32>
    %56 = arith.select %53, %51, %55 : vector<64x64xi1>, vector<64x64xf32>
    %57 = arith.truncf %56 : vector<64x64xf32> to vector<64x64xbf16>
    %c2_32 = arith.constant 2 : index
    %c0_33 = arith.constant 0 : index
    %c0_34 = arith.constant 0 : index
    %58 = vector.load %arg3[%c2_32, %c0_33, %c0_34] : memref<4x64x512xbf16, #tpu.memory_space<vmem>>, vector<1x64x512xbf16>
    %59 = vector.shape_cast %58 : vector<1x64x512xbf16> to vector<64x512xbf16>
    %cst_35 = arith.constant dense<0.000000e+00> : vector<64x512xf32>
    %60 = tpu.matmul %57, %59, %cst_35 {dimension_numbers = #tpu.dot_dimension_numbers<[1], [0], [0], [1], [0, 0, 1, 1], [], []>} : vector<64x64xbf16>, vector<64x512xbf16>, vector<64x512xf32> -> vector<64x512xf32>
    %61 = vector.shape_cast %60 : vector<64x512xf32> to vector<1x8x8x512xf32>
    %62 = vector.extract_strided_slice %61 {offsets = [0, 0, 0, 0], sizes = [1, 7, 7, 128], strides = [1, 1, 1, 1]} : vector<1x8x8x512xf32> to vector<1x7x7x128xf32>
    %63 = arith.addf %46, %62 : vector<1x7x7x128xf32>
    %64 = vector.extract_strided_slice %61 {offsets = [0, 0, 1, 128], sizes = [1, 7, 7, 128], strides = [1, 1, 1, 1]} : vector<1x8x8x512xf32> to vector<1x7x7x128xf32>
    %65 = arith.addf %63, %64 : vector<1x7x7x128xf32>
    %66 = vector.extract_strided_slice %61 {offsets = [0, 1, 0, 256], sizes = [1, 7, 7, 128], strides = [1, 1, 1, 1]} : vector<1x8x8x512xf32> to vector<1x7x7x128xf32>
    %67 = arith.addf %65, %66 : vector<1x7x7x128xf32>
    %68 = vector.extract_strided_slice %61 {offsets = [0, 1, 1, 384], sizes = [1, 7, 7, 128], strides = [1, 1, 1, 1]} : vector<1x8x8x512xf32> to vector<1x7x7x128xf32>
    %69 = arith.addf %67, %68 : vector<1x7x7x128xf32>
    %c0_36 = arith.constant 0 : index
    %c3 = arith.constant 3 : index
    %c0_37 = arith.constant 0 : index
    %c0_38 = arith.constant 0 : index
    %70 = vector.load %arg1[%c0_36, %c3, %c0_37, %c0_38] : memref<1x4x64x16xbf16, #tpu.memory_space<vmem>>, vector<1x1x64x16xbf16>
    %71 = vector.shape_cast %70 : vector<1x1x64x16xbf16> to vector<1x64x16xbf16>
    %72 = vector.shape_cast %71 : vector<1x64x16xbf16> to vector<64x16xbf16>
    %c0_39 = arith.constant 0 : index
    %c0_40 = arith.constant 0 : index
    %73 = vector.load %arg2[%c0_39, %c0_40] : memref<16x64xbf16, #tpu.memory_space<vmem>>, vector<16x64xbf16>
    %cst_41 = arith.constant dense<0.000000e+00> : vector<64x64xf32>
    %74 = tpu.matmul %72, %73, %cst_41 {dimension_numbers = #tpu.dot_dimension_numbers<[1], [0], [0], [1], [0, 0, 1, 1], [], []>} : vector<64x16xbf16>, vector<16x64xbf16>, vector<64x64xf32> -> vector<64x64xf32>
    %cst_42 = arith.constant 0.000000e+00 : f32
    %75 = vector.broadcast %cst_42 : f32 to vector<64x64xf32>
    %76 = arith.cmpf ogt, %74, %75 : vector<64x64xf32>
    %cst_43 = arith.constant 2.000000e-01 : f32
    %77 = vector.broadcast %cst_43 : f32 to vector<64x64xf32>
    %78 = arith.mulf %77, %74 : vector<64x64xf32>
    %79 = arith.select %76, %74, %78 : vector<64x64xi1>, vector<64x64xf32>
    %80 = arith.truncf %79 : vector<64x64xf32> to vector<64x64xbf16>
    %c3_44 = arith.constant 3 : index
    %c0_45 = arith.constant 0 : index
    %c0_46 = arith.constant 0 : index
    %81 = vector.load %arg3[%c3_44, %c0_45, %c0_46] : memref<4x64x512xbf16, #tpu.memory_space<vmem>>, vector<1x64x512xbf16>
    %82 = vector.shape_cast %81 : vector<1x64x512xbf16> to vector<64x512xbf16>
    %cst_47 = arith.constant dense<0.000000e+00> : vector<64x512xf32>
    %83 = tpu.matmul %80, %82, %cst_47 {dimension_numbers = #tpu.dot_dimension_numbers<[1], [0], [0], [1], [0, 0, 1, 1], [], []>} : vector<64x64xbf16>, vector<64x512xbf16>, vector<64x512xf32> -> vector<64x512xf32>
    %84 = vector.shape_cast %83 : vector<64x512xf32> to vector<1x8x8x512xf32>
    %85 = vector.extract_strided_slice %84 {offsets = [0, 0, 0, 0], sizes = [1, 7, 7, 128], strides = [1, 1, 1, 1]} : vector<1x8x8x512xf32> to vector<1x7x7x128xf32>
    %86 = arith.addf %69, %85 : vector<1x7x7x128xf32>
    %87 = vector.extract_strided_slice %84 {offsets = [0, 0, 1, 128], sizes = [1, 7, 7, 128], strides = [1, 1, 1, 1]} : vector<1x8x8x512xf32> to vector<1x7x7x128xf32>
    %88 = arith.addf %86, %87 : vector<1x7x7x128xf32>
    %89 = vector.extract_strided_slice %84 {offsets = [0, 1, 0, 256], sizes = [1, 7, 7, 128], strides = [1, 1, 1, 1]} : vector<1x8x8x512xf32> to vector<1x7x7x128xf32>
    %90 = arith.addf %88, %89 : vector<1x7x7x128xf32>
    %91 = vector.extract_strided_slice %84 {offsets = [0, 1, 1, 384], sizes = [1, 7, 7, 128], strides = [1, 1, 1, 1]} : vector<1x8x8x512xf32> to vector<1x7x7x128xf32>
    %92 = arith.addf %90, %91 : vector<1x7x7x128xf32>
    %93 = arith.truncf %92 : vector<1x7x7x128xf32> to vector<1x7x7x128xbf16>
    %c0_48 = arith.constant 0 : index
    %c0_49 = arith.constant 0 : index
    %c0_50 = arith.constant 0 : index
    %c0_51 = arith.constant 0 : index
    %94 = vector.load %arg4[%c0_48, %c0_49, %c0_50, %c0_51] : memref<1x7x7x128xbf16, #tpu.memory_space<vmem>>, vector<1x7x7x128xbf16>
    tpu.vector_store %arg4[%c0_48, %c0_49, %c0_50, %c0_51], %93 {strides = array<i32>} : memref<1x7x7x128xbf16, #tpu.memory_space<vmem>>, vector<1x7x7x128xbf16>,
    %cst_52 = arith.constant dense<0.000000e+00> : vector<1x7x128xf32>
    %95 = vector.multi_reduction <add>, %92, %cst_52 [2] : vector<1x7x7x128xf32> to vector<1x7x128xf32>
    %96 = vector.shape_cast %95 : vector<1x7x128xf32> to vector<1x7x1x128xf32>
    %cst_53 = arith.constant dense<0.000000e+00> : vector<1x1x128xf32>
    %97 = vector.multi_reduction <add>, %96, %cst_53 [1] : vector<1x7x1x128xf32> to vector<1x1x128xf32>
    %98 = vector.shape_cast %97 : vector<1x1x128xf32> to vector<1x1x1x128xf32>
    %cst_54 = arith.constant dense<0.000000e+00> : vector<1x1x128xf32>
    %99 = vector.multi_reduction <add>, %98, %cst_54 [0] : vector<1x1x1x128xf32> to vector<1x1x128xf32>
    %100 = vector.shape_cast %99 : vector<1x1x128xf32> to vector<1x1x1x128xf32>
    %c0_55 = arith.constant 0 : index
    %c0_56 = arith.constant 0 : index
    %c0_57 = arith.constant 0 : index
    %c0_58 = arith.constant 0 : index
    %101 = vector.load %arg5[%c0_55, %c0_56, %c0_57, %c0_58] : memref<1x1x1x128xf32, #tpu.memory_space<vmem>>, vector<1x1x1x128xf32>
    tpu.vector_store %arg5[%c0_55, %c0_56, %c0_57, %c0_58], %100 {strides = array<i32>} : memref<1x1x1x128xf32, #tpu.memory_space<vmem>>, vector<1x1x1x128xf32>,
    %102 = arith.mulf %92, %92 : vector<1x7x7x128xf32>
    %cst_59 = arith.constant dense<0.000000e+00> : vector<1x7x128xf32>
    %103 = vector.multi_reduction <add>, %102, %cst_59 [2] : vector<1x7x7x128xf32> to vector<1x7x128xf32>
    %104 = vector.shape_cast %103 : vector<1x7x128xf32> to vector<1x7x1x128xf32>
    %cst_60 = arith.constant dense<0.000000e+00> : vector<1x1x128xf32>
    %105 = vector.multi_reduction <add>, %104, %cst_60 [1] : vector<1x7x1x128xf32> to vector<1x1x128xf32>
    %106 = vector.shape_cast %105 : vector<1x1x128xf32> to vector<1x1x1x128xf32>
    %cst_61 = arith.constant dense<0.000000e+00> : vector<1x1x128xf32>
    %107 = vector.multi_reduction <add>, %106, %cst_61 [0] : vector<1x1x1x128xf32> to vector<1x1x128xf32>
    %108 = vector.shape_cast %107 : vector<1x1x128xf32> to vector<1x1x1x128xf32>
    %c0_62 = arith.constant 0 : index
    %c0_63 = arith.constant 0 : index
    %c0_64 = arith.constant 0 : index
    %c0_65 = arith.constant 0 : index
    %109 = vector.load %arg6[%c0_62, %c0_63, %c0_64, %c0_65] : memref<1x1x1x128xf32, #tpu.memory_space<vmem>>, vector<1x1x1x128xf32>
    tpu.vector_store %arg6[%c0_62, %c0_63, %c0_64, %c0_65], %108 {strides = array<i32>} : memref<1x1x1x128xf32, #tpu.memory_space<vmem>>, vector<1x1x1x128xf32>,
    return
  }
  func.func @transform_0(%arg0: i32) -> (i32, i32, i32, i32) {
    %c0_i32 = arith.constant 0 : i32
    %c0_i32_0 = arith.constant 0 : i32
    %c0_i32_1 = arith.constant 0 : i32
    %c0_i32_2 = arith.constant 0 : i32
    return %arg0, %c0_i32, %c0_i32_0, %c0_i32_1 : i32, i32, i32, i32
  }
  func.func @transform_1(%arg0: i32) -> (i32, i32) {
    %c0_i32 = arith.constant 0 : i32
    %c0_i32_0 = arith.constant 0 : i32
    %c0_i32_1 = arith.constant 0 : i32
    return %c0_i32, %c0_i32_0 : i32, i32
  }
  func.func @transform_2(%arg0: i32) -> (i32, i32, i32) {
    %c0_i32 = arith.constant 0 : i32
    %c0_i32_0 = arith.constant 0 : i32
    %c0_i32_1 = arith.constant 0 : i32
    %c0_i32_2 = arith.constant 0 : i32
    return %c0_i32, %c0_i32_0, %c0_i32_1 : i32, i32, i32
  }
  func.func @transform_3(%arg0: i32) -> (i32, i32, i32, i32) {
    %c0_i32 = arith.constant 0 : i32
    %c0_i32_0 = arith.constant 0 : i32
    %c0_i32_1 = arith.constant 0 : i32
    %c0_i32_2 = arith.constant 0 : i32
    return %arg0, %c0_i32, %c0_i32_0, %c0_i32_1 : i32, i32, i32, i32
  }
  func.func @transform_4(%arg0: i32) -> (i32, i32, i32, i32) {
    %c0_i32 = arith.constant 0 : i32
    %c0_i32_0 = arith.constant 0 : i32
    %c0_i32_1 = arith.constant 0 : i32
    %c0_i32_2 = arith.constant 0 : i32
    return %arg0, %c0_i32, %c0_i32_0, %c0_i32_1 : i32, i32, i32, i32
  }
  func.func @transform_5(%arg0: i32) -> (i32, i32, i32, i32) {
    %c0_i32 = arith.constant 0 : i32
    %c0_i32_0 = arith.constant 0 : i32
    %c0_i32_1 = arith.constant 0 : i32
    %c0_i32_2 = arith.constant 0 : i32
    return %arg0, %c0_i32, %c0_i32_0, %c0_i32_1 : i32, i32, i32, i32
  }
}

module attributes {stable_mosaic.version = 11 : i64} {
  func.func @_bn_lrelu_head_kernel(%arg0: i32, %arg1: memref<1x7x7x128xbf16, #tpu.memory_space<vmem>>, %arg2: memref<1x1x1x128xf32, #tpu.memory_space<vmem>>, %arg3: memref<1x1x1x128xf32, #tpu.memory_space<vmem>>, %arg4: memref<1x7x7x128xf32, #tpu.memory_space<vmem>>, %arg5: memref<1x1x1x1xf32, #tpu.memory_space<vmem>>) attributes {dimension_semantics = [#tpu.dimension_semantics<parallel>], iteration_bounds = array<i64: 2>, scalar_prefetch = 0 : i64, scratch_operands = 0 : i64, tpu.core_type = #tpu.core_type<tc>, window_params = [{transform_indices = @transform_0, window_bounds = array<i64: 1, 7, 7, 128>}, {pipeline_mode = #tpu.pipeline_mode<synchronous>, transform_indices = @transform_1, window_bounds = array<i64: 1, 1, 1, 128>}, {pipeline_mode = #tpu.pipeline_mode<synchronous>, transform_indices = @transform_2, window_bounds = array<i64: 1, 1, 1, 128>}, {pipeline_mode = #tpu.pipeline_mode<synchronous>, transform_indices = @transform_3, window_bounds = array<i64: 1, 7, 7, 128>}, {transform_indices = @transform_4, window_bounds = array<i64: 1, 1, 1, 1>}]} {
    %c0 = arith.constant 0 : index
    %c0_0 = arith.constant 0 : index
    %c0_1 = arith.constant 0 : index
    %c0_2 = arith.constant 0 : index
    %0 = vector.load %arg1[%c0, %c0_0, %c0_1, %c0_2] : memref<1x7x7x128xbf16, #tpu.memory_space<vmem>>, vector<1x7x7x128xbf16>
    %1 = arith.extf %0 : vector<1x7x7x128xbf16> to vector<1x7x7x128xf32>
    %c0_3 = arith.constant 0 : index
    %c0_4 = arith.constant 0 : index
    %c0_5 = arith.constant 0 : index
    %c0_6 = arith.constant 0 : index
    %2 = vector.load %arg2[%c0_3, %c0_4, %c0_5, %c0_6] : memref<1x1x1x128xf32, #tpu.memory_space<vmem>>, vector<1x1x1x128xf32>
    %3 = vector.broadcast %2 : vector<1x1x1x128xf32> to vector<1x7x7x128xf32>
    %4 = arith.mulf %1, %3 : vector<1x7x7x128xf32>
    %c0_7 = arith.constant 0 : index
    %c0_8 = arith.constant 0 : index
    %c0_9 = arith.constant 0 : index
    %c0_10 = arith.constant 0 : index
    %5 = vector.load %arg3[%c0_7, %c0_8, %c0_9, %c0_10] : memref<1x1x1x128xf32, #tpu.memory_space<vmem>>, vector<1x1x1x128xf32>
    %6 = vector.broadcast %5 : vector<1x1x1x128xf32> to vector<1x7x7x128xf32>
    %7 = arith.addf %4, %6 : vector<1x7x7x128xf32>
    %cst = arith.constant 0.000000e+00 : f32
    %8 = vector.broadcast %cst : f32 to vector<1x7x7x128xf32>
    %9 = arith.cmpf ogt, %7, %8 : vector<1x7x7x128xf32>
    %cst_11 = arith.constant 2.000000e-01 : f32
    %10 = vector.broadcast %cst_11 : f32 to vector<1x7x7x128xf32>
    %11 = arith.mulf %10, %7 : vector<1x7x7x128xf32>
    %12 = arith.select %9, %7, %11 : vector<1x7x7x128xi1>, vector<1x7x7x128xf32>
    %c0_12 = arith.constant 0 : index
    %c0_13 = arith.constant 0 : index
    %c0_14 = arith.constant 0 : index
    %c0_15 = arith.constant 0 : index
    %13 = vector.load %arg4[%c0_12, %c0_13, %c0_14, %c0_15] : memref<1x7x7x128xf32, #tpu.memory_space<vmem>>, vector<1x7x7x128xf32>
    %14 = arith.mulf %12, %13 : vector<1x7x7x128xf32>
    %cst_16 = arith.constant dense<0.000000e+00> : vector<1x7x128xf32>
    %15 = vector.multi_reduction <add>, %14, %cst_16 [2] : vector<1x7x7x128xf32> to vector<1x7x128xf32>
    %16 = vector.shape_cast %15 : vector<1x7x128xf32> to vector<1x7x1x128xf32>
    %cst_17 = arith.constant dense<0.000000e+00> : vector<1x1x128xf32>
    %17 = vector.multi_reduction <add>, %16, %cst_17 [1] : vector<1x7x1x128xf32> to vector<1x1x128xf32>
    %18 = vector.shape_cast %17 : vector<1x1x128xf32> to vector<1x1x1x128xf32>
    %cst_18 = arith.constant dense<0.000000e+00> : vector<1x1x1xf32>
    %19 = vector.multi_reduction <add>, %18, %cst_18 [3] : vector<1x1x1x128xf32> to vector<1x1x1xf32>
    %20 = vector.shape_cast %19 : vector<1x1x1xf32> to vector<1x1x1x1xf32>
    %21 = arith.negf %20 : vector<1x1x1x1xf32>
    %22 = math.exp %21 : vector<1x1x1x1xf32>
    %cst_19 = arith.constant 1.000000e+00 : f32
    %23 = vector.broadcast %cst_19 : f32 to vector<1x1x1x1xf32>
    %24 = arith.addf %23, %22 : vector<1x1x1x1xf32>
    %25 = arith.divf %23, %24 : vector<1x1x1x1xf32>
    %c0_20 = arith.constant 0 : index
    %c0_21 = arith.constant 0 : index
    %c0_22 = arith.constant 0 : index
    %c0_23 = arith.constant 0 : index
    %26 = vector.load %arg5[%c0_20, %c0_21, %c0_22, %c0_23] : memref<1x1x1x1xf32, #tpu.memory_space<vmem>>, vector<1x1x1x1xf32>
    tpu.vector_store %arg5[%c0_20, %c0_21, %c0_22, %c0_23], %25 {strides = array<i32>} : memref<1x1x1x1xf32, #tpu.memory_space<vmem>>, vector<1x1x1x1xf32>,
    return
  }
  func.func @transform_0(%arg0: i32) -> (i32, i32, i32, i32) {
    %c0_i32 = arith.constant 0 : i32
    %c0_i32_0 = arith.constant 0 : i32
    %c0_i32_1 = arith.constant 0 : i32
    %c0_i32_2 = arith.constant 0 : i32
    return %arg0, %c0_i32, %c0_i32_0, %c0_i32_1 : i32, i32, i32, i32
  }
  func.func @transform_1(%arg0: i32) -> (i32, i32, i32, i32) {
    %c0_i32 = arith.constant 0 : i32
    %c0_i32_0 = arith.constant 0 : i32
    %c0_i32_1 = arith.constant 0 : i32
    %c0_i32_2 = arith.constant 0 : i32
    %c0_i32_3 = arith.constant 0 : i32
    return %c0_i32, %c0_i32_0, %c0_i32_1, %c0_i32_2 : i32, i32, i32, i32
  }
  func.func @transform_2(%arg0: i32) -> (i32, i32, i32, i32) {
    %c0_i32 = arith.constant 0 : i32
    %c0_i32_0 = arith.constant 0 : i32
    %c0_i32_1 = arith.constant 0 : i32
    %c0_i32_2 = arith.constant 0 : i32
    %c0_i32_3 = arith.constant 0 : i32
    return %c0_i32, %c0_i32_0, %c0_i32_1, %c0_i32_2 : i32, i32, i32, i32
  }
  func.func @transform_3(%arg0: i32) -> (i32, i32, i32, i32) {
    %c0_i32 = arith.constant 0 : i32
    %c0_i32_0 = arith.constant 0 : i32
    %c0_i32_1 = arith.constant 0 : i32
    %c0_i32_2 = arith.constant 0 : i32
    %c0_i32_3 = arith.constant 0 : i32
    return %c0_i32, %c0_i32_0, %c0_i32_1, %c0_i32_2 : i32, i32, i32, i32
  }
  func.func @transform_4(%arg0: i32) -> (i32, i32, i32, i32) {
    %c0_i32 = arith.constant 0 : i32
    %c0_i32_0 = arith.constant 0 : i32
    %c0_i32_1 = arith.constant 0 : i32
    %c0_i32_2 = arith.constant 0 : i32
    return %arg0, %c0_i32, %c0_i32_0, %c0_i32_1 : i32, i32, i32, i32
  }
}

</mosaic_0001>

<bundles_post_ra>
// kernel: discriminator_forward.3
= control target key start
LH: loop header
LB: loop body
LE: loop exit
PB: predicated region body
PF: predicated region fallthrough
CT: control target
= control target key end

     0   :  { %s462_s15 = smov 0   ;;  %s524_s0 = inlined_call_operand.vmem [shape: bf16[2,7,7,128], index: 0, kind: input, shape index: {}]   ;;  %s525_s1 = inlined_call_operand.vmem [shape: f32[1,1,1,128], index: 1, kind: input, shape index: {}]   ;;  %s526_s2 = inlined_call_operand.vmem [shape: f32[1,1,1,128], index: 2, kind: input, shape index: {}]   ;;  %s527_s3 = inlined_call_operand.vmem [shape: f32[1,7,7,128], index: 3, kind: input, shape index: {}]   ;;  %s528_s4 = inlined_call_operand.vmem [shape: f32[2,1,1,1], index: 4, kind: output, shape index: {}]  }
   0x1 LB: > { %s391_s16 = sadd.s32 4294967295, %s435_s15   ;;  %p395_p0 = scmp.ge.s32.totalorder %s435_s15, 1  ;;  %s435_s15 = sphi %s462_s15, %s14_s15  }
   0x2   : > { %p162_p1 = scmp.lt.s32.totalorder %s435_s15, 3 }
   0x4   : > { %p163_p2 = pnand %p395_p0, %p162_p1 }
   0x5   : > { %p186_p3 = scmp.lt.s32.totalorder (!%p163_p2), %s391_s16, 1 }
   0x6   : > { %166 = sbr.rel (%p163_p2) target bundleno = 199 (0xc7), region = 36 }
   0xb   : > { %s530_s16 = smov (!%p186_p3, %s391_s16), 1  ;;  %v423_v0 = vld [vmem:[%s525_s1] ss:$0 sm:$0xff]  ;;  %vm265_vm0 = vcmask 1046528   ;;  %v252_v28 = vld [vmem:[%s527_s3 + $0x8] sm:$0x7f] }
   0xc   : > { %s414_s17 = smul.u32 28, %s530_s16  ;;  %v424_v9 = vld [vmem:[%s526_s2] ss:$0 sm:$0xff]  ;;  %v253_v30 = vld [vmem:[%s527_s3 + $0x10] sm:$0x7f]  ;;  %vm342_vm11 = vcmask 0  }
   0xd   : > { %v251_v27 = vld [vmem:[%s527_s3] sm:$0x7f]  ;;  %v254_v31 = vld [vmem:[%s527_s3 + $0x18] sm:$0x7f]  ;;  %v256_v33 = vld [vmem:[%s527_s3 + $0x28] sm:$0x7f] }
   0xe   : > { %s190_s20 = scalar_lea.vmem %s524_s0, %s414_s17  ;;  %v255_v32 = vld [vmem:[%s527_s3 + $0x20] sm:$0x7f]  ;;  %v257_v44 = vld [vmem:[%s527_s3 + $0x30] sm:$0x7f]  ;;  %s193_s17 = scalar_lea.vmem %s528_s4, %s530_s16 }
   0xf   : > { %v401_v1 = vld [vmem:[%s190_s20] sm:$0xff]   ;;  %v412_v2 = vld [vmem:[%s190_s20 + $0x8] sm:$0xff]   ;;  %v413_v3 = vld [vmem:[%s190_s20 + $0x10] sm:$0xff]  }
  0x10   : > { %v402_v4 = vunpack.c.l.bf16 %v401_v1  ;;  %v403_v5 = vunpack.c.h.bf16 %v401_v1  ;;  %v406_v6 = vunpack.c.l.bf16 %v412_v2  ;;  %v407_v7 = vunpack.c.h.bf16 %v412_v2  ;;  %v200_v8 = vld [vmem:[%s190_s20 + $0x18] sm:$0xf] }
  0x11   : > { %v410_v10 = vunpack.c.l.bf16 %v413_v3  ;;  %v411_v11 = vunpack.c.h.bf16 %v413_v3  ;;  %v207_v12 = vunpack.c.l.bf16 %v200_v8 }
  0x12   : > { %v212_v13 = vmul.f32 %v423_v0, %v402_v4  ;;  %v213_v14 = vmul.f32 %v423_v0, %v403_v5  ;;  %v214_v15 = vmul.f32 %v423_v0, %v406_v6  ;;  %v215_v16 = vmul.f32 %v423_v0, %v407_v7 }
  0x13   : > { %v216_v17 = vmul.f32 %v423_v0, %v410_v10  ;;  %v217_v18 = vmul.f32 %v423_v0, %v411_v11  ;;  %v218_v19 = vmul.f32 %v423_v0, %v207_v12 }
  0x14   : > { %v223_v20 = vadd.f32 %v424_v9, %v212_v13  ;;  %v224_v21 = vadd.f32 %v424_v9, %v213_v14  ;;  %v225_v22 = vadd.f32 %v424_v9, %v214_v15  ;;  %v226_v23 = vadd.f32 %v424_v9, %v215_v16 }
  0x15   : > { %v227_v24 = vadd.f32 %v424_v9, %v216_v17  ;;  %v228_v25 = vadd.f32 %v424_v9, %v217_v18  ;;  %v229_v26 = vadd.f32 %v424_v9, %v218_v19 }
  0x16   : > { %vm230_vm1 = vcmp.gt.f32.partialorder %v223_v20, 0.0  ;;  %vm231_vm2 = vcmp.gt.f32.partialorder %v224_v21, 0.0  ;;  %vm232_vm3 = vcmp.gt.f32.partialorder %v225_v22, 0.0  ;;  %vm233_vm4 = vcmp.gt.f32.partialorder %v226_v23, 0.0 }
  0x17   : > { %vm234_vm5 = vcmp.gt.f32.partialorder %v227_v24, 0.0  ;;  %vm235_vm6 = vcmp.gt.f32.partialorder %v228_v25, 0.0  ;;  %vm236_vm7 = vcmp.gt.f32.partialorder %v229_v26, 0.0  ;;  %v237_v29 = vmul.f32 0.2, %v223_v20 }
  0x18   : > { %v238_v34 = vmul.f32 0.2, %v224_v21  ;;  %v239_v35 = vmul.f32 0.2, %v225_v22  ;;  %v240_v36 = vmul.f32 0.2, %v226_v23 }
  0x19   : > { %v241_v37 = vmul.f32 0.2, %v227_v24  ;;  %v242_v38 = vmul.f32 0.2, %v228_v25  ;;  %v243_v39 = vmul.f32 0.2, %v229_v26  ;;  %v244_v40 = vsel %vm230_vm1, %v223_v20, %v237_v29 }
  0x1a   : > { %v245_v41 = vsel %vm231_vm2, %v224_v21, %v238_v34  ;;  %v246_v42 = vsel %vm232_vm3, %v225_v22, %v239_v35  ;;  %v247_v43 = vsel %vm233_vm4, %v226_v23, %v240_v36  ;;  %v258_v45 = vmul.f32 %v251_v27, %v244_v40 }
  0x1b   : > { %v248_v46 = vsel %vm234_vm5, %v227_v24, %v241_v37  ;;  %v249_v47 = vsel %vm235_vm6, %v228_v25, %v242_v38  ;;  %v250_v48 = vsel %vm236_vm7, %v229_v26, %v243_v39  ;;  %v259_v49 = vmul.f32 %v252_v28, %v245_v41 }
  0x1c   : > { %v260_v50 = vmul.f32 %v253_v30, %v246_v42  ;;  %v261_v51 = vmul.f32 %v254_v31, %v247_v43  ;;  %v262_v52 = vmul.f32 %v255_v32, %v248_v46  ;;  %v263_v53 = vmul.f32 %v256_v33, %v249_v47 }
  0x1d   : > { %v264_v54 = vmul.f32 %v257_v44, %v250_v48  ;;  %v266_v55 = vsel %vm265_vm0, %v258_v45, 0.0  ;;  %v273_v56 = vsel %vm265_vm0, %v259_v49, 0.0 }
  0x1e   : > { %v267_v57 = vrot.slane %v266_v55, 4  ;;  %v274_v58 = vrot.slane %v273_v56, 4  ;;  %v280_v59 = vsel %vm265_vm0, %v260_v50, 0.0  ;;  %v287_v60 = vsel %vm265_vm0, %v261_v51, 0.0 }
  0x1f   : > { %v281_v61 = vrot.slane %v280_v59, 4  ;;  %v288_v62 = vrot.slane %v287_v60, 4  ;;  %v294_v63 = vsel %vm265_vm0, %v262_v52, 0.0  ;;  %v301_v0 = vsel %vm265_vm0, %v263_v53, 0.0 }
  0x20   : > { %v268_v1 = vadd.f32 %v267_v57, %v266_v55  ;;  %v275_v2 = vadd.f32 %v274_v58, %v273_v56  ;;  %v295_v3 = vrot.slane %v294_v63, 4  ;;  %v302_v4 = vrot.slane %v301_v0, 4 }
  0x21   : > { %v282_v5 = vadd.f32 %v281_v61, %v280_v59  ;;  %v289_v6 = vadd.f32 %v288_v62, %v287_v60  ;;  %v308_v7 = vsel %vm265_vm0, %v264_v54, 0.0 }
  0x22   : > { %v269_v8 = vrot.slane %v268_v1, 2  ;;  %v276_v9 = vrot.slane %v275_v2, 2  ;;  %v296_v10 = vadd.f32 %v295_v3, %v294_v63  ;;  %v303_v11 = vadd.f32 %v302_v4, %v301_v0 }
  0x23   : > { %v283_v12 = vrot.slane %v282_v5, 2  ;;  %v290_v13 = vrot.slane %v289_v6, 2  ;;  %v309_v14 = vrot.slane %v308_v7, 4 }
  0x24   : > { %v270_v15 = vadd.f32 %v269_v8, %v268_v1  ;;  %v277_v16 = vadd.f32 %v276_v9, %v275_v2  ;;  %v297_v17 = vrot.slane %v296_v10, 2  ;;  %v304_v18 = vrot.slane %v303_v11, 2 }
  0x25   : > { %v284_v19 = vadd.f32 %v283_v12, %v282_v5  ;;  %v291_v20 = vadd.f32 %v290_v13, %v289_v6  ;;  %v310_v21 = vadd.f32 %v309_v14, %v308_v7 }
  0x26   : > { %v271_v22 = vrot.slane %v270_v15, 1  ;;  %v278_v23 = vrot.slane %v277_v16, 1  ;;  %v298_v24 = vadd.f32 %v297_v17, %v296_v10  ;;  %v305_v25 = vadd.f32 %v304_v18, %v303_v11 }
  0x27   : > { %v285_v26 = vrot.slane %v284_v19, 1  ;;  %v292_v27 = vrot.slane %v291_v20, 1  ;;  %v311_v28 = vrot.slane %v310_v21, 2 }
  0x28   : > { %v272_v29 = vadd.f32 %v271_v22, %v270_v15  ;;  %v279_v30 = vadd.f32 %v278_v23, %v277_v16  ;;  %v299_v31 = vrot.slane %v298_v24, 1  ;;  %v306_v35 = vrot.slane %v305_v25, 1 }
  0x29   : > { %v286_v32 = vadd.f32 %v285_v26, %v284_v19  ;;  %v312_v33 = vadd.f32 %v311_v28, %v310_v21  ;;  %v293_v34 = vadd.f32 %v292_v27, %v291_v20 }
  0x2a   : > { %v315_v36 = vadd.f32 %v279_v30, %v272_v29  ;;  %v300_v37 = vadd.f32 %v299_v31, %v298_v24  ;;  %v307_v40 = vadd.f32 %v306_v35, %v305_v25 }
  0x2b   : > { %v313_v38 = vrot.slane %v312_v33, 1 }
  0x2c   : > { %v316_v39 = vadd.f32 %v315_v36, %v286_v32 }
  0x2d   : > { %v314_v42 = vadd.f32 %v313_v38, %v312_v33 }
  0x2e   : > { %v317_v41 = vadd.f32 %v316_v39, %v293_v34 }
  0x30   : > { %v318_v43 = vadd.f32 %v317_v41, %v300_v37 }
  0x32   : > { %v319_v44 = vadd.f32 %v318_v43, %v307_v40 }
  0x34   : > { %v320_v45 = vadd.f32 %v319_v44, %v314_v42 }
  0x36   : > { %321 = vadd.xlane.f32.xlu0 %v320_v45 }
  0xa9   : > { %v322_v46 = vpop.xlane.xlu0 %321 }
  0xaa   : > { %v397_v47 = vmul.f32 -1.442695, %v322_v46 }
  0xac   : > { %425 = vpow2.f32 %v397_v47 }
  0xb2   : > { %v426_v48 = vpop.eup %425 }
  0xb3   : > { %v326_v49 = vadd.f32 1.0, %v426_v48 }
  0xb5   : > { %427 = vrcp.f32 %v326_v49  ;;  %v338_v53 = vand.u32 2147483648, %v326_v49  ;;  %v336_v55 = vand.u32 2147483647, %v326_v49  ;;  %vm332_vm9 = vweird.f32 %v326_v49 }
  0xb7   : > { %v339_v57 = vor.u32 1.1754944e-38, %v338_v53  ;;  %vm337_vm12 = vcmp.eq.f32.partialorder %v336_v55, 8.507059e+37 }
  0xbb   : > { %v428_v50 = vpop.eup %427 }
  0xbc   : > { %v328_v51 = vmul.f32 %v428_v50, %v326_v49  ;;  %vm333_vm8 = vweird.f32 %v428_v50 }
  0xbd   : > { %vm334_vm10 = vmor %vm332_vm9, %vm333_vm8 }
  0xbe   : > { %v329_v52 = vsub.f32 1.0, %v328_v51 }
  0xc0   : > { %v330_v54 = vmul.f32 %v428_v50, %v329_v52 }
  0xc2   : > { %v331_v56 = vadd.f32 %v428_v50, %v330_v54 }
  0xc4   : > { %v335_v58 = vsel %vm334_vm10, %v428_v50, %v331_v56 }
  0xc5   : > { %v340_v59 = vsel %vm337_vm12, %v339_v57, %v335_v58 }
  0xc6   : > { %343 = vst.msk [vmem:[%s193_s17] sm:$0x1] %vm342_vm11, %v340_v59 }
  0xc7 PF: > { %s14_s15 = sadd.s32 1, %s435_s15  }
  0xc8   : > { %p11_p4 = scmp.ge.s32.totalorder %s14_s15, 4  }
  0xca   :  { %13 = sbr.rel (!%p11_p4) target bundleno = 1 (0x1), region = 66 }

// kernel: discriminator_forward.2
= control target key start
LH: loop header
LB: loop body
LE: loop exit
PB: predicated region body
PF: predicated region fallthrough
CT: control target
= control target key end

     0   :  { %s2680_s18 = smov 0   ;;  %s3365_s0 = inlined_call_operand.vmem [shape: bf16[2,4,64,16], index: 0, kind: input, shape index: {}]   ;;  %s3366_s1 = inlined_call_operand.vmem [shape: bf16[16,64], index: 1, kind: input, shape index: {}]   ;;  %s3367_s2 = inlined_call_operand.vmem [shape: bf16[4,64,512], index: 2, kind: input, shape index: {}]   ;;  %s3368_s3 = inlined_call_operand.vmem [shape: bf16[2,7,7,128], index: 3, kind: output, shape index: {0}]   ;;  %s3369_s4 = inlined_call_operand.vmem [shape: f32[2,1,1,128], index: 4, kind: output, shape index: {1}]   ;;  %s3370_s5 = inlined_call_operand.vmem [shape: f32[2,1,1,128], index: 5, kind: output, shape index: {2}]  }
   0x1 LB: > { %s2065_s19 = sadd.s32 4294967295, %s2648_s18   ;;  %p2069_p0 = scmp.ge.s32.totalorder %s2648_s18, 1  ;;  %s2648_s18 = sphi %s2680_s18, %s16_s18  }
   0x2   : > { %p192_p1 = scmp.lt.s32.totalorder %s2648_s18, 3 }
   0x4   : > { %p193_p2 = pnand %p2069_p0, %p192_p1 }
   0x5   : > { %p226_p3 = scmp.lt.s32.totalorder (!%p193_p2), %s2065_s19, 1 }
   0x6   : > { %196 = sbr.rel (%p193_p2) target bundleno = 986 (0x3da), region = 32 }
   0xb   : > { %v2691_v0 = vld [vmem:[%s3366_s1] sm:$0xff]  ;;  %s3374_s19 = smov (!%p226_p3, %s2065_s19), 1  ;;  %vm279_vm0 = vcmask 130048   ;;  %v2571_v4 = vld [vmem:[%s3367_s2 + $0x6c] sm:$0xf0]  ;;  %vm445_vm3 = vcmask 523264  }
   0xc   : > { %299 = vmatpush.bf16.msra.mxu0 %v2691_v0  ;;  %s2551_s22 = sshll.u32 %s3374_s19, 7  ;;  %v2147_v3 = vld [vmem:[%s3367_s2 + $0x60] sm:$0xf]  ;;  %v2569_v5 = vld [vmem:[%s3367_s2 + $0x64] sm:$0xf]  ;;  %s2633_s12 = smul.u32 28, %s3374_s19 }
   0xd   : > { %s2700_s25 = scalar_lea.vmem %s3365_s0, %s2551_s22  ;;  %v2148_v6 = vor.u32 %v2571_v4, %v2147_v3  ;;  %v2149_v7 = vld [vmem:[%s3367_s2 + $0x70] sm:$0xf0]  ;;  %v2155_v8 = vld [vmem:[%s3367_s2 + $0x68] sm:$0xf]  ;;  %v2572_v9 = vld [vmem:[%s3367_s2 + $0x74] sm:$0xf0]  ;;  %s238_s20 = scalar_lea.vmem %s3369_s4, %s3374_s19 }
   0xe   : > { %v2552_v1 = vld [vmem:[%s2700_s25] sm:$0xff]  ;;  %v2553_v2 = vld [vmem:[%s2700_s25 + $0x8] sm:$0xff]  ;;  %v2152_v10 = vor.u32 %v2569_v5, %v2149_v7  ;;  %v2156_v11 = vor.u32 %v2572_v9, %v2155_v8  ;;  %v2157_v13 = vld [vmem:[%s3367_s2 + $0x78] sm:$0xf0]  ;;  %s3293_s15 = scalar_lea.vmem %s3368_s3, %s2633_s12  ;;  %s241_s23 = scalar_lea.vmem %s3370_s5, %s3374_s19 }
   0xf   : > { %2093 = vmatmul.msk.bf16.vlgmr.msra.gmra.mxu0 %vm279_vm0, %v2552_v1  ;;  %v2570_v12 = vld [vmem:[%s3367_s2 + $0x6c] sm:$0xf]  ;;  %462 = vmatpush.bf16.msra.mxu1 %v2148_v6  ;;  %v2554_v15 = vld [vmem:[%s2700_s25 + $0x10] sm:$0xff]  ;;  %v2555_v16 = vld [vmem:[%s2700_s25 + $0x18] sm:$0xff] }
  0x10   : > { %v2160_v14 = vor.u32 %v2570_v12, %v2157_v13  ;;  %490 = vmatpush.bf16.msra.mxu2 %v2152_v10  ;;  %518 = vmatpush.bf16.msra.mxu3 %v2156_v11  ;;  %v2131_v17 = vld [vmem:[%s3367_s2 + $0x40] sm:$0xf]  ;;  %v2567_v18 = vld [vmem:[%s3367_s2 + $0x4c] sm:$0xf0]  ;;  %v2565_v19 = vld [vmem:[%s3367_s2 + $0x44] sm:$0xf] }
  0x11   : > { %v2132_v20 = vor.u32 %v2567_v18, %v2131_v17  ;;  %v2133_v21 = vld [vmem:[%s3367_s2 + $0x50] sm:$0xf0]  ;;  %v2139_v22 = vld [vmem:[%s3367_s2 + $0x48] sm:$0xf]  ;;  %v2568_v23 = vld [vmem:[%s3367_s2 + $0x54] sm:$0xf0] }
  0x12   : > { %546 = vmatpush.bf16.msrb.mxu0 %v2160_v14  ;;  %v2136_v24 = vor.u32 %v2565_v19, %v2133_v21  ;;  %v2140_v25 = vor.u32 %v2568_v23, %v2139_v22  ;;  %v2566_v26 = vld [vmem:[%s3367_s2 + $0x4c] sm:$0xf]  ;;  %v2141_v27 = vld [vmem:[%s3367_s2 + $0x58] sm:$0xf0]  ;;  %v2115_v29 = vld [vmem:[%s3367_s2 + $0x20] sm:$0xf] }
  0x13   : > { %463 = vmatpush.bf16.msra.mxu1 %v2132_v20  ;;  %v2144_v28 = vor.u32 %v2566_v26, %v2141_v27  ;;  %v2563_v30 = vld [vmem:[%s3367_s2 + $0x2c] sm:$0xf0]  ;;  %v2561_v31 = vld [vmem:[%s3367_s2 + $0x24] sm:$0xf]  ;;  %v2117_v33 = vld [vmem:[%s3367_s2 + $0x30] sm:$0xf0] }
  0x14   : > { %491 = vmatpush.bf16.msra.mxu2 %v2136_v24  ;;  %519 = vmatpush.bf16.msra.mxu3 %v2140_v25  ;;  %v2116_v32 = vor.u32 %v2563_v30, %v2115_v29  ;;  %v2123_v34 = vld [vmem:[%s3367_s2 + $0x28] sm:$0xf]  ;;  %v2564_v35 = vld [vmem:[%s3367_s2 + $0x34] sm:$0xf0]  ;;  %v2120_v36 = vor.u32 %v2561_v31, %v2117_v33  ;;  %v2562_v38 = vld [vmem:[%s3367_s2 + $0x2c] sm:$0xf] }
  0x15   : > { %v2124_v37 = vor.u32 %v2564_v35, %v2123_v34  ;;  %v2125_v39 = vld [vmem:[%s3367_s2 + $0x38] sm:$0xf0]  ;;  %v2099_v41 = vld [vmem:[%s3367_s2] sm:$0xf]  ;;  %v2559_v42 = vld [vmem:[%s3367_s2 + $0xc] sm:$0xf0] }
  0x16   : > { %547 = vmatpush.bf16.msrb.mxu0 %v2144_v28  ;;  %v2128_v40 = vor.u32 %v2562_v38, %v2125_v39  ;;  %v2557_v43 = vld [vmem:[%s3367_s2 + $0x4] sm:$0xf]  ;;  %v2100_v44 = vor.u32 %v2559_v42, %v2099_v41  ;;  %v2101_v45 = vld [vmem:[%s3367_s2 + $0x10] sm:$0xf0]  ;;  %v2107_v46 = vld [vmem:[%s3367_s2 + $0x8] sm:$0xf] }
  0x17   : > { %464 = vmatpush.bf16.msra.mxu1 %v2116_v32  ;;  %v2560_v47 = vld [vmem:[%s3367_s2 + $0x14] sm:$0xf0]  ;;  %v2104_v48 = vor.u32 %v2557_v43, %v2101_v45  ;;  %v2558_v50 = vld [vmem:[%s3367_s2 + $0xc] sm:$0xf]  ;;  %v2109_v51 = vld [vmem:[%s3367_s2 + $0x18] sm:$0xf0] }
  0x18   : > { %492 = vmatpush.bf16.msra.mxu2 %v2120_v36  ;;  %520 = vmatpush.bf16.msra.mxu3 %v2124_v37  ;;  %v2108_v49 = vor.u32 %v2560_v47, %v2107_v46  ;;  %v2112_v52 = vor.u32 %v2558_v50, %v2109_v51  ;;  %v2573_v18 = vld [vmem:[%s2700_s25 + $0x20] sm:$0xff]  ;;  %v2574_v19 = vld [vmem:[%s2700_s25 + $0x28] sm:$0xff]  ;;  %v2575_v20 = vld [vmem:[%s2700_s25 + $0x30] sm:$0xff] }
  0x19   : > { %v2576_v21 = vld [vmem:[%s2700_s25 + $0x38] sm:$0xff]  ;;  %v2271_v22 = vld [vmem:[%s3367_s2 + $0xe0] sm:$0xf]  ;;  %v2591_v23 = vld [vmem:[%s3367_s2 + $0xec] sm:$0xf0] }
  0x1a   : > { %548 = vmatpush.bf16.msrb.mxu0 %v2128_v40  ;;  %v2272_v24 = vor.u32 %v2591_v23, %v2271_v22  ;;  %v2255_v26 = vld [vmem:[%s3367_s2 + $0xc0] sm:$0xf]  ;;  %v2587_v27 = vld [vmem:[%s3367_s2 + $0xcc] sm:$0xf0]  ;;  %v2582_v22 = vld [vmem:[%s3367_s2 + $0xac] sm:$0xf] }
  0x1b   : > { %465 = vmatpush.bf16.msra.mxu1 %v2100_v44  ;;  %v2256_v29 = vor.u32 %v2587_v27, %v2255_v26  ;;  %v2239_v39 = vld [vmem:[%s3367_s2 + $0xa0] sm:$0xf]  ;;  %v2583_v40 = vld [vmem:[%s3367_s2 + $0xac] sm:$0xf0] }
  0x1c   : > { %493 = vmatpush.bf16.msra.mxu2 %v2104_v48  ;;  %521 = vmatpush.bf16.msra.mxu3 %v2108_v49  ;;  %v2240_v42 = vor.u32 %v2583_v40, %v2239_v39  ;;  %v2231_v39 = vld [vmem:[%s3367_s2 + $0x88] sm:$0xf] }
  0x1e   : > { %549 = vmatpush.bf16.msrb.mxu0 %v2112_v52 }
  0x1f   : > { %2094 = vmatmul.msk.bf16.gmra.mxu0 %vm279_vm0, %v2553_v2  ;;  %688 = vmatpush.bf16.msrb.mxu1 %v2691_v0 }
  0x20   : > { %851 = vmatpush.bf16.msrb.mxu2 %v2272_v24  ;;  %v2249_v24 = vld [vmem:[%s3367_s2 + $0xb8] sm:$0xf0] }
  0x21   : > { %v2252_v27 = vor.u32 %v2582_v22, %v2249_v24 }
  0x24   : > { %852 = vmatpush.bf16.msrb.mxu2 %v2256_v29 }
  0x28   : > { %853 = vmatpush.bf16.msrb.mxu2 %v2240_v42  ;;  %v2580_v42 = vld [vmem:[%s3367_s2 + $0x94] sm:$0xf0] }
  0x2f   : > { %2095 = vmatmul.msk.bf16.gmra.mxu0 %vm279_vm0, %v2554_v15 }
  0x3f   : > { %2096 = vmatmul.msk.bf16.gmra.mxu0 %vm279_vm0, %v2555_v16 }
  0x8c   : > { %v301_v53 = vpop.f32.mrf.mxu0 }
  0x8d   : > { %v329_v54 = vmul.f32 0.2, %v301_v53  ;;  %vm321_vm1 = vcmp.gt.f32.partialorder %v301_v53, 0.0 }
  0x8f   : > { %v337_v57 = vsel %vm321_vm1, %v301_v53, %v329_v54  ;;  %v2589_v54 = vld [vmem:[%s3367_s2 + $0xe4] sm:$0xf] }
  0x94   : > { %v303_v55 = vpop.f32.mrf.mxu0 }
  0x95   : > { %vm322_vm2 = vcmp.gt.f32.partialorder %v303_v55, 0.0  ;;  %v330_v56 = vmul.f32 0.2, %v303_v55 }
  0x97   : > { %v338_v58 = vsel %vm322_vm2, %v303_v55, %v330_v56  ;;  %v2273_v55 = vld [vmem:[%s3367_s2 + $0xf0] sm:$0xf0]  ;;  %v2279_v56 = vld [vmem:[%s3367_s2 + $0xe8] sm:$0xf] }
  0x98   : > { %v345_v59 = vpack.c.bf16 %v338_v58, %v337_v57  ;;  %v2276_v58 = vor.u32 %v2589_v54, %v2273_v55 }
  0x9a   : > { %2161 = vmatmul.msk.bf16.vlgmr.msra.gmra.mxu1 %vm445_vm3, %v345_v59  ;;  %2165 = vmatmul.msk.bf16.vlgmr.msra.gmra.mxu2 %vm445_vm3, %v345_v59 }
  0x9b   : > { %2169 = vmatmul.msk.bf16.vlgmr.msra.gmra.mxu3 %vm445_vm3, %v345_v59  ;;  %2173 = vmatmul.msk.bf16.vlgmr.msrb.gmra.mxu0 %vm445_vm3, %v345_v59  ;;  %v2592_v59 = vld [vmem:[%s3367_s2 + $0xf4] sm:$0xf0] }
  0x9c   : > { %v306_v60 = vpop.f32.mrf.mxu0  ;;  %879 = vmatpush.bf16.msrb.mxu3 %v2276_v58 }
  0x9d   : > { %v331_v61 = vmul.f32 0.2, %v306_v60  ;;  %vm323_vm4 = vcmp.gt.f32.partialorder %v306_v60, 0.0 }
  0x9f   : > { %v339_v1 = vsel %vm323_vm4, %v306_v60, %v331_v61  ;;  %v2590_v60 = vld [vmem:[%s3367_s2 + $0xec] sm:$0xf]  ;;  %v2281_v61 = vld [vmem:[%s3367_s2 + $0xf8] sm:$0xf0] }
  0xa4   : > { %v308_v62 = vpop.f32.mrf.mxu0 }
  0xa5   : > { %vm324_vm5 = vcmp.gt.f32.partialorder %v308_v62, 0.0  ;;  %v332_v63 = vmul.f32 0.2, %v308_v62 }
  0xa7   : > { %v340_v2 = vsel %vm324_vm5, %v308_v62, %v332_v63  ;;  %v2280_v63 = vor.u32 %v2592_v59, %v2279_v56 }
  0xa8   : > { %v346_v3 = vpack.c.bf16 %v340_v2, %v339_v1  ;;  %v2284_v1 = vor.u32 %v2590_v60, %v2281_v61 }
  0xa9   : > { %907 = vmatpush.bf16.msra.mxu0 %v2280_v63 }
  0xaa   : > { %2162 = vmatmul.msk.bf16.gmra.mxu1 %vm445_vm3, %v346_v3  ;;  %2166 = vmatmul.msk.bf16.gmra.mxu2 %vm445_vm3, %v346_v3 }
  0xab   : > { %2170 = vmatmul.msk.bf16.gmra.mxu3 %vm445_vm3, %v346_v3  ;;  %2174 = vmatmul.msk.bf16.gmra.mxu0 %vm445_vm3, %v346_v3  ;;  %v2223_v3 = vld [vmem:[%s3367_s2 + $0x80] sm:$0xf] }
  0xac   : > { %v311_v4 = vpop.f32.mrf.mxu0  ;;  %935 = vmatpush.bf16.msra.mxu1 %v2284_v1 }
  0xad   : > { %v333_v5 = vmul.f32 0.2, %v311_v4  ;;  %vm325_vm6 = vcmp.gt.f32.partialorder %v311_v4, 0.0 }
  0xaf   : > { %v341_v8 = vsel %vm325_vm6, %v311_v4, %v333_v5  ;;  %v2579_v4 = vld [vmem:[%s3367_s2 + $0x8c] sm:$0xf0] }
  0xb4   : > { %v313_v6 = vpop.f32.mrf.mxu0 }
  0xb5   : > { %vm326_vm7 = vcmp.gt.f32.partialorder %v313_v6, 0.0  ;;  %v334_v7 = vmul.f32 0.2, %v313_v6 }
  0xb7   : > { %v342_v9 = vsel %vm326_vm7, %v313_v6, %v334_v7  ;;  %v2224_v6 = vor.u32 %v2579_v4, %v2223_v3  ;;  %v2585_v7 = vld [vmem:[%s3367_s2 + $0xc4] sm:$0xf] }
  0xb8   : > { %v347_v10 = vpack.c.bf16 %v342_v9, %v341_v8  ;;  %v2257_v8 = vld [vmem:[%s3367_s2 + $0xd0] sm:$0xf0]  ;;  %v2263_v9 = vld [vmem:[%s3367_s2 + $0xc8] sm:$0xf] }
  0xb9   : > { %854 = vmatpush.bf16.msrb.mxu2 %v2224_v6 }
  0xba   : > { %2163 = vmatmul.msk.bf16.gmra.mxu1 %vm445_vm3, %v347_v10  ;;  %2167 = vmatmul.msk.bf16.gmra.mxu2 %vm445_vm3, %v347_v10 }
  0xbb   : > { %2171 = vmatmul.msk.bf16.gmra.mxu3 %vm445_vm3, %v347_v10  ;;  %2175 = vmatmul.msk.bf16.gmra.mxu0 %vm445_vm3, %v347_v10 }
  0xbc   : > { %v316_v11 = vpop.f32.mrf.mxu0 }
  0xbd   : > { %v335_v12 = vmul.f32 0.2, %v316_v11  ;;  %vm327_vm8 = vcmp.gt.f32.partialorder %v316_v11, 0.0  ;;  %1077 = vmatpush.bf16.msra.mxu2 %v2691_v0 }
  0xbf   : > { %v343_v15 = vsel %vm327_vm8, %v316_v11, %v335_v12  ;;  %v2260_v11 = vor.u32 %v2585_v7, %v2257_v8  ;;  %v2588_v12 = vld [vmem:[%s3367_s2 + $0xd4] sm:$0xf0] }
  0xc1   : > { %880 = vmatpush.bf16.msrb.mxu3 %v2260_v11 }
  0xc4   : > { %v318_v13 = vpop.f32.mrf.mxu0 }
  0xc5   : > { %vm328_vm9 = vcmp.gt.f32.partialorder %v318_v13, 0.0  ;;  %v336_v14 = vmul.f32 0.2, %v318_v13 }
  0xc7   : > { %v344_v16 = vsel %vm328_vm9, %v318_v13, %v336_v14  ;;  %v2586_v13 = vld [vmem:[%s3367_s2 + $0xcc] sm:$0xf]  ;;  %v2264_v14 = vor.u32 %v2588_v12, %v2263_v9 }
  0xc8   : > { %v348_v17 = vpack.c.bf16 %v344_v16, %v343_v15  ;;  %v2265_v15 = vld [vmem:[%s3367_s2 + $0xd8] sm:$0xf0]  ;;  %v2581_v16 = vld [vmem:[%s3367_s2 + $0xa4] sm:$0xf] }
  0xc9   : > { %908 = vmatpush.bf16.msra.mxu0 %v2264_v14 }
  0xca   : > { %2164 = vmatmul.msk.bf16.gmra.mxu1 %vm445_vm3, %v348_v17  ;;  %2168 = vmatmul.msk.bf16.gmra.mxu2 %vm445_vm3, %v348_v17 }
  0xcb   : > { %2172 = vmatmul.msk.bf16.gmra.mxu3 %vm445_vm3, %v348_v17  ;;  %2176 = vmatmul.msk.bf16.gmra.mxu0 %vm445_vm3, %v348_v17  ;;  %v2241_v17 = vld [vmem:[%s3367_s2 + $0xb0] sm:$0xf0] }
  0xda   : > { %2201 = vmatmul.msk.bf16.vlgmr.msrb.gmra.mxu1 %vm279_vm0, %v2573_v18  ;;  %v2268_v18 = vor.u32 %v2586_v13, %v2265_v15 }
  0xdc   : > { %936 = vmatpush.bf16.msra.mxu1 %v2268_v18 }
  0xe0   : > { %937 = vmatpush.bf16.msra.mxu1 %v2252_v27 }
  0xea   : > { %2202 = vmatmul.msk.bf16.gmra.mxu1 %vm279_vm0, %v2574_v19  ;;  %v2244_v19 = vor.u32 %v2581_v16, %v2241_v17 }
  0xec   : > { %881 = vmatpush.bf16.msrb.mxu3 %v2244_v19 }
  0xfa   : > { %2203 = vmatmul.msk.bf16.gmra.mxu1 %vm279_vm0, %v2575_v20  ;;  %v2247_v20 = vld [vmem:[%s3367_s2 + $0xa8] sm:$0xf] }
 0x10a   : > { %2204 = vmatmul.msk.bf16.gmra.mxu1 %vm279_vm0, %v2576_v21  ;;  %v2584_v21 = vld [vmem:[%s3367_s2 + $0xb4] sm:$0xf0] }
 0x10b   : > { %v2248_v23 = vor.u32 %v2584_v21, %v2247_v20 }
 0x10d   : > { %909 = vmatpush.bf16.msra.mxu0 %v2248_v23 }
 0x117   : > { %v467_v25 = vpop.f32.mrf.mxu1 }
 0x118   : > { %v551_v28 = vpop.f32.mrf.mxu0 }
 0x11d   : > { %v495_v30 = vpop.f32.mrf.mxu2 }
 0x11e   : > { %v584_v31 = vrot.slane %v495_v30, 1  ;;  %v523_v32 = vpop.f32.mrf.mxu3 }
 0x11f   : > { %v469_v33 = vpop.f32.mrf.mxu1 }
 0x120   : > { %v2843_v34 = vadd.f32 %v584_v31, %v467_v25  ;;  %v2845_v35 = vpop.f32.mrf.mxu0 }
 0x125   : > { %v497_v36 = vpop.f32.mrf.mxu2 }
 0x126   : > { %v2847_v37 = vpop.f32.mrf.mxu3  ;;  %v585_v43 = vrot.slane %v497_v36, 1  ;;  %v2577_v36 = vld [vmem:[%s3367_s2 + $0x84] sm:$0xf] }
 0x127   : > { %v472_v38 = vpop.f32.mrf.mxu1 }
 0x128   : > { %v555_v41 = vpop.f32.mrf.mxu0  ;;  %v599_v45 = vadd.f32 %v585_v43, %v469_v33  ;;  %v2578_v43 = vld [vmem:[%s3367_s2 + $0x8c] sm:$0xf] }
 0x129   : > { %v620_v48 = vrot.slane %v555_v41, 1 }
 0x12d   : > { %v500_v44 = vpop.f32.mrf.mxu2 }
 0x12e   : > { %v586_v46 = vrot.slane %v500_v44, 1  ;;  %v527_v47 = vpop.f32.mrf.mxu3 }
 0x12f   : > { %v606_v49 = vadd.f32 %v599_v45, %v527_v47  ;;  %v474_v50 = vpop.f32.mrf.mxu1  ;;  %v2232_v45 = vor.u32 %v2580_v42, %v2231_v39  ;;  %v2596_v39 = vld [vmem:[%s2700_s25 + $0x58] sm:$0xff]  ;;  %v2611_v42 = vld [vmem:[%s3367_s2 + $0x16c] sm:$0xf0] }
 0x130   : > { %v2855_v51 = vadd.f32 %v586_v46, %v472_v38  ;;  %v2857_v52 = vpop.f32.mrf.mxu0  ;;  %v2225_v38 = vld [vmem:[%s3367_s2 + $0x90] sm:$0xf0]  ;;  %v2233_v46 = vld [vmem:[%s3367_s2 + $0x98] sm:$0xf0] }
 0x131   : > { %v2859_v53 = vadd.f32 %v620_v48, %v606_v49  ;;  %v2228_v41 = vor.u32 %v2577_v36, %v2225_v38  ;;  %v2236_v47 = vor.u32 %v2578_v43, %v2233_v46  ;;  %910 = vmatpush.bf16.msra.mxu0 %v2232_v45  ;;  %v2594_v36 = vld [vmem:[%s2700_s25 + $0x48] sm:$0xff]  ;;  %v2595_v38 = vld [vmem:[%s2700_s25 + $0x50] sm:$0xff] }
 0x133   : > { %882 = vmatpush.bf16.msrb.mxu3 %v2228_v41  ;;  %938 = vmatpush.bf16.msra.mxu1 %v2236_v47  ;;  %v2395_v41 = vld [vmem:[%s3367_s2 + $0x160] sm:$0xf]  ;;  %v605_v47 = vadd.f32 %v2843_v34, %v2847_v37 }
 0x134   : > { %v2396_v43 = vor.u32 %v2611_v42, %v2395_v41  ;;  %v2397_v41 = vld [vmem:[%s3367_s2 + $0x170] sm:$0xf0]  ;;  %v2403_v42 = vld [vmem:[%s3367_s2 + $0x168] sm:$0xf] }
 0x135   : > { %v502_v57 = vpop.f32.mrf.mxu2 }
 0x136   : > { %v2879_v62 = vpop.f32.mrf.mxu3  ;;  %v587_v10 = vrot.slane %v502_v57, 1 }
 0x137   : > { %v477_v2 = vpop.f32.mrf.mxu1  ;;  %1240 = vmatpush.bf16.msra.mxu3 %v2396_v43 }
 0x138   : > { %v560_v5 = vpop.f32.mrf.mxu0  ;;  %v601_v26 = vadd.f32 %v587_v10, %v474_v50 }
 0x139   : > { %v622_v30 = vrot.slane %v560_v5, 1 }
 0x13d   : > { %v505_v25 = vpop.f32.mrf.mxu2 }
 0x13e   : > { %v588_v28 = vrot.slane %v505_v25, 1  ;;  %v532_v29 = vpop.f32.mrf.mxu3 }
 0x13f   : > { %v608_v31 = vadd.f32 %v601_v26, %v532_v29  ;;  %v479_v32 = vpop.f32.mrf.mxu1 }
 0x140   : > { %v2924_v33 = vadd.f32 %v588_v28, %v477_v2  ;;  %v2943_v44 = vpop.f32.mrf.mxu0 }
 0x141   : > { %v2935_v40 = vadd.f32 %v622_v30, %v608_v31 }
 0x145   : > { %v507_v48 = vpop.f32.mrf.mxu2 }
 0x146   : > { %v2948_v49 = vpop.f32.mrf.mxu3  ;;  %v589_v54 = vrot.slane %v507_v48, 1 }
 0x147   : > { %v482_v50 = vpop.f32.mrf.mxu1 }
 0x148   : > { %v565_v55 = vpop.f32.mrf.mxu0  ;;  %v603_v57 = vadd.f32 %v589_v54, %v479_v32  ;;  %v2593_v32 = vld [vmem:[%s2700_s25 + $0x40] sm:$0xff]  ;;  %v619_v54 = vrot.slane %v2845_v35, 1 }
 0x149   : > { %v624_v60 = vrot.slane %v565_v55, 1  ;;  %v2379_v55 = vld [vmem:[%s3367_s2 + $0x140] sm:$0xf] }
 0x14d   : > { %v510_v56 = vpop.f32.mrf.mxu2 }
 0x14e   : > { %v590_v58 = vrot.slane %v510_v56, 1  ;;  %v537_v59 = vpop.f32.mrf.mxu3  ;;  %v2607_v56 = vld [vmem:[%s3367_s2 + $0x14c] sm:$0xf0] }
 0x14f   : > { %v610_v61 = vadd.f32 %v603_v57, %v537_v59  ;;  %v484_v63 = vpop.f32.mrf.mxu1  ;;  %v2380_v57 = vor.u32 %v2607_v56, %v2379_v55 }
 0x150   : > { %v2950_v1 = vadd.f32 %v590_v58, %v482_v50  ;;  %v2984_v45 = vpop.f32.mrf.mxu0  ;;  %v633_v58 = vadd.f32 %v619_v54, %v605_v47  ;;  %v2612_v47 = vld [vmem:[%s3367_s2 + $0x174] sm:$0xf0] }
 0x151   : > { %v2952_v2 = vadd.f32 %v624_v60, %v610_v61  ;;  %1241 = vmatpush.bf16.msra.mxu3 %v2380_v57  ;;  %v2404_v57 = vor.u32 %v2612_v47, %v2403_v42  ;;  %v2357_v42 = vld [vmem:[%s3367_s2 + $0x118] sm:$0xf0] }
 0x153   : > { %1296 = vmatpush.bf16.msrb.mxu1 %v2404_v57 }
 0x155   : > { %v512_v3 = vpop.f32.mrf.mxu2 }
 0x156   : > { %v2986_v46 = vpop.f32.mrf.mxu3 }
 0x157   : > { %v690_v4 = vpop.f32.mrf.mxu1 }
 0x158   : > { %v718_v5 = vmul.f32 0.2, %v690_v4  ;;  %vm710_vm10 = vcmp.gt.f32.partialorder %v690_v4, 0.0 }
 0x15a   : > { %v726_v8 = vsel %vm710_vm10, %v690_v4, %v718_v5 }
 0x15f   : > { %v692_v6 = vpop.f32.mrf.mxu1 }
 0x160   : > { %vm711_vm11 = vcmp.gt.f32.partialorder %v692_v6, 0.0  ;;  %v719_v7 = vmul.f32 0.2, %v692_v6 }
 0x162   : > { %v727_v9 = vsel %vm711_vm11, %v692_v6, %v719_v7 }
 0x163   : > { %v734_v10 = vpack.c.bf16 %v727_v9, %v726_v8 }
 0x165   : > { %2285 = vmatmul.msk.bf16.vlgmr.msrb.gmra.mxu2 %vm445_vm3, %v734_v10  ;;  %2289 = vmatmul.msk.bf16.vlgmr.msrb.gmra.mxu3 %vm445_vm3, %v734_v10 }
 0x166   : > { %2293 = vmatmul.msk.bf16.vlgmr.msra.gmra.mxu0 %vm445_vm3, %v734_v10  ;;  %2297 = vmatmul.msk.bf16.vlgmr.msra.gmra.mxu1 %vm445_vm3, %v734_v10  ;;  %v607_v10 = vadd.f32 %v2855_v51, %v2879_v62 }
 0x167   : > { %v695_v11 = vpop.f32.mrf.mxu1 }
 0x168   : > { %v720_v12 = vmul.f32 0.2, %v695_v11  ;;  %vm712_vm12 = vcmp.gt.f32.partialorder %v695_v11, 0.0 }
 0x16a   : > { %v728_v15 = vsel %vm712_vm12, %v695_v11, %v720_v12 }
 0x16f   : > { %v697_v13 = vpop.f32.mrf.mxu1 }
 0x170   : > { %vm713_vm13 = vcmp.gt.f32.partialorder %v697_v13, 0.0  ;;  %v721_v14 = vmul.f32 0.2, %v697_v13 }
 0x172   : > { %v729_v16 = vsel %vm713_vm13, %v697_v13, %v721_v14  ;;  %v621_v14 = vrot.slane %v2857_v52, 1 }
 0x173   : > { %v735_v17 = vpack.c.bf16 %v729_v16, %v728_v15 }
 0x175   : > { %2286 = vmatmul.msk.bf16.gmra.mxu2 %vm445_vm3, %v735_v17  ;;  %2290 = vmatmul.msk.bf16.gmra.mxu3 %vm445_vm3, %v735_v17 }
 0x176   : > { %2294 = vmatmul.msk.bf16.gmra.mxu0 %vm445_vm3, %v735_v17  ;;  %2298 = vmatmul.msk.bf16.gmra.mxu1 %vm445_vm3, %v735_v17  ;;  %v2363_v17 = vld [vmem:[%s3367_s2 + $0x120] sm:$0xf] }
 0x177   : > { %v700_v18 = vpop.f32.mrf.mxu1 }
 0x178   : > { %v722_v19 = vmul.f32 0.2, %v700_v18  ;;  %vm714_vm14 = vcmp.gt.f32.partialorder %v700_v18, 0.0 }
 0x17a   : > { %v730_v22 = vsel %vm714_vm14, %v700_v18, %v722_v19  ;;  %v2603_v18 = vld [vmem:[%s3367_s2 + $0x12c] sm:$0xf0]  ;;  %v635_v19 = vadd.f32 %v621_v14, %v607_v10  ;;  %v2365_v14 = vld [vmem:[%s3367_s2 + $0x130] sm:$0xf0] }
 0x17f   : > { %v702_v20 = vpop.f32.mrf.mxu1 }
 0x180   : > { %vm715_vm15 = vcmp.gt.f32.partialorder %v702_v20, 0.0  ;;  %v723_v21 = vmul.f32 0.2, %v702_v20 }
 0x182   : > { %v731_v23 = vsel %vm715_vm15, %v702_v20, %v723_v21 }
 0x183   : > { %v736_v24 = vpack.c.bf16 %v731_v23, %v730_v22 }
 0x185   : > { %2287 = vmatmul.msk.bf16.gmra.mxu2 %vm445_vm3, %v736_v24  ;;  %2291 = vmatmul.msk.bf16.gmra.mxu3 %vm445_vm3, %v736_v24 }
 0x186   : > { %2295 = vmatmul.msk.bf16.gmra.mxu0 %vm445_vm3, %v736_v24  ;;  %2299 = vmatmul.msk.bf16.gmra.mxu1 %vm445_vm3, %v736_v24 }
 0x187   : > { %v705_v25 = vpop.f32.mrf.mxu1 }
 0x188   : > { %v724_v26 = vmul.f32 0.2, %v705_v25  ;;  %vm716_vm1 = vcmp.gt.f32.partialorder %v705_v25, 0.0 }
 0x18a   : > { %v732_v29 = vsel %vm716_vm1, %v705_v25, %v724_v26 }
 0x18f   : > { %v707_v27 = vpop.f32.mrf.mxu1 }
 0x190   : > { %vm717_vm2 = vcmp.gt.f32.partialorder %v707_v27, 0.0  ;;  %v725_v28 = vmul.f32 0.2, %v707_v27 }
 0x192   : > { %v733_v30 = vsel %vm717_vm2, %v707_v27, %v725_v28 }
 0x193   : > { %v737_v31 = vpack.c.bf16 %v733_v30, %v732_v29  ;;  %v2347_v30 = vld [vmem:[%s3367_s2 + $0x100] sm:$0xf] }
 0x195   : > { %2288 = vmatmul.msk.bf16.gmra.mxu2 %vm445_vm3, %v737_v31  ;;  %2292 = vmatmul.msk.bf16.gmra.mxu3 %vm445_vm3, %v737_v31 }
 0x196   : > { %2296 = vmatmul.msk.bf16.gmra.mxu0 %vm445_vm3, %v737_v31  ;;  %2300 = vmatmul.msk.bf16.gmra.mxu1 %vm445_vm3, %v737_v31  ;;  %v2599_v31 = vld [vmem:[%s3367_s2 + $0x10c] sm:$0xf0] }
 0x1a5   : > { %2325 = vmatmul.msk.bf16.vlgmr.msra.gmra.mxu2 %vm279_vm0, %v2593_v32  ;;  %v2609_v32 = vld [vmem:[%s3367_s2 + $0x164] sm:$0xf] }
 0x1a6   : > { %v2400_v43 = vor.u32 %v2609_v32, %v2397_v41  ;;  %v2598_v32 = vld [vmem:[%s3367_s2 + $0x10c] sm:$0xf] }
 0x1a7   : > { %v2360_v47 = vor.u32 %v2598_v32, %v2357_v42 }
 0x1a8   : > { %1268 = vmatpush.bf16.msrb.mxu0 %v2400_v43 }
 0x1b5   : > { %2326 = vmatmul.msk.bf16.gmra.mxu2 %vm279_vm0, %v2594_v36 }
 0x1c5   : > { %2327 = vmatmul.msk.bf16.gmra.mxu2 %vm279_vm0, %v2595_v38 }
 0x1d5   : > { %2328 = vmatmul.msk.bf16.gmra.mxu2 %vm279_vm0, %v2596_v39  ;;  %v2348_v39 = vor.u32 %v2599_v31, %v2347_v30  ;;  %v2355_v31 = vld [vmem:[%s3367_s2 + $0x108] sm:$0xf] }
 0x1e3   : > { %v912_v48 = vpop.f32.mrf.mxu0  ;;  %v940_v50 = vpop.f32.mrf.mxu1 }
 0x1e4   : > { %v2610_v48 = vld [vmem:[%s3367_s2 + $0x16c] sm:$0xf]  ;;  %v609_v50 = vadd.f32 %v2924_v33, %v2948_v49 }
 0x1e8   : > { %v856_v59 = vpop.f32.mrf.mxu2  ;;  %v884_v60 = vpop.f32.mrf.mxu3 }
 0x1e9   : > { %v959_v61 = vadd.f32 %v856_v59, %v633_v58  ;;  %v973_v63 = vrot.slane %v884_v60, 1  ;;  %v623_v59 = vrot.slane %v2943_v44, 1 }
 0x1eb   : > { %v913_v34 = vpop.f32.mrf.mxu0  ;;  %v987_v37 = vadd.f32 %v973_v63, %v959_v61  ;;  %v941_v3 = vpop.f32.mrf.mxu1  ;;  %v637_v63 = vadd.f32 %v623_v59, %v609_v50 }
 0x1ec   : > { %v1008_v35 = vrot.slane %v941_v3, 1 }
 0x1ed   : > { %v994_v4 = vadd.f32 %v987_v37, %v913_v34 }
 0x1ef   : > { %v2997_v5 = vadd.f32 %v1008_v35, %v994_v4  ;;  %v2605_v4 = vld [vmem:[%s3367_s2 + $0x144] sm:$0xf]  ;;  %v2387_v35 = vld [vmem:[%s3367_s2 + $0x148] sm:$0xf] }
 0x1f0   : > { %v858_v6 = vpop.f32.mrf.mxu2  ;;  %v886_v7 = vpop.f32.mrf.mxu3 }
 0x1f1   : > { %v960_v8 = vadd.f32 %v858_v6, %v2859_v53  ;;  %v974_v9 = vrot.slane %v886_v7, 1  ;;  %v2364_v53 = vor.u32 %v2603_v18, %v2363_v17  ;;  %v2608_v6 = vld [vmem:[%s3367_s2 + $0x154] sm:$0xf0]  ;;  %v2606_v7 = vld [vmem:[%s3367_s2 + $0x14c] sm:$0xf] }
 0x1f2   : > { %v2371_v17 = vld [vmem:[%s3367_s2 + $0x128] sm:$0xf]  ;;  %v2604_v18 = vld [vmem:[%s3367_s2 + $0x134] sm:$0xf0] }
 0x1f3   : > { %v916_v11 = vpop.f32.mrf.mxu0  ;;  %v988_v12 = vadd.f32 %v974_v9, %v960_v8  ;;  %v944_v13 = vpop.f32.mrf.mxu1  ;;  %1242 = vmatpush.bf16.msra.mxu3 %v2364_v53 }
 0x1f4   : > { %v1009_v16 = vrot.slane %v944_v13, 1  ;;  %v2601_v13 = vld [vmem:[%s3367_s2 + $0x124] sm:$0xf] }
 0x1f5   : > { %v995_v15 = vadd.f32 %v988_v12, %v916_v11  ;;  %v2388_v11 = vor.u32 %v2608_v6, %v2387_v35  ;;  %v2389_v12 = vld [vmem:[%s3367_s2 + $0x158] sm:$0xf0] }
 0x1f7   : > { %v3009_v20 = vadd.f32 %v1009_v16, %v995_v15  ;;  %1243 = vmatpush.bf16.msra.mxu3 %v2348_v39  ;;  %v2392_v15 = vor.u32 %v2606_v7, %v2389_v12  ;;  %v2368_v16 = vor.u32 %v2601_v13, %v2365_v14  ;;  %1297 = vmatpush.bf16.msrb.mxu1 %v2388_v11 }
 0x1f8   : > { %v861_v51 = vpop.f32.mrf.mxu2  ;;  %v889_v62 = vpop.f32.mrf.mxu3 }
 0x1f9   : > { %v961_v21 = vadd.f32 %v861_v51, %v635_v19  ;;  %v975_v22 = vrot.slane %v889_v62, 1  ;;  %v2372_v51 = vor.u32 %v2604_v18, %v2371_v17  ;;  %v2602_v62 = vld [vmem:[%s3367_s2 + $0x12c] sm:$0xf] }
 0x1fb   : > { %v918_v52 = vpop.f32.mrf.mxu0  ;;  %v989_v23 = vadd.f32 %v975_v22, %v961_v21  ;;  %v946_v24 = vpop.f32.mrf.mxu1  ;;  %1466 = vmatpush.bf16.msrb.mxu3 %v2691_v0  ;;  %v2381_v0 = vld [vmem:[%s3367_s2 + $0x150] sm:$0xf0]  ;;  %v2373_v21 = vld [vmem:[%s3367_s2 + $0x138] sm:$0xf0]  ;;  %1298 = vmatpush.bf16.msrb.mxu1 %v2372_v51 }
 0x1fc   : > { %v1010_v26 = vrot.slane %v946_v24, 1  ;;  %v2384_v44 = vor.u32 %v2605_v4, %v2381_v0  ;;  %v2376_v22 = vor.u32 %v2602_v62, %v2373_v21  ;;  %v2613_v21 = vld [vmem:[%s2700_s25 + $0x60] sm:$0xff] }
 0x1fd   : > { %v996_v25 = vadd.f32 %v989_v23, %v918_v52 }
 0x1fe   : > { %1269 = vmatpush.bf16.msrb.mxu0 %v2384_v44 }
 0x1ff   : > { %v3011_v27 = vadd.f32 %v1010_v26, %v996_v25 }
 0x200   : > { %v863_v28 = vpop.f32.mrf.mxu2  ;;  %v891_v29 = vpop.f32.mrf.mxu3 }
 0x201   : > { %v962_v36 = vadd.f32 %v863_v28, %v2935_v40  ;;  %v976_v38 = vrot.slane %v891_v29, 1  ;;  %v2405_v40 = vld [vmem:[%s3367_s2 + $0x178] sm:$0xf0]  ;;  %v2597_v28 = vld [vmem:[%s3367_s2 + $0x104] sm:$0xf] }
 0x202   : > { %v2408_v58 = vor.u32 %v2610_v48, %v2405_v40  ;;  %1270 = vmatpush.bf16.msrb.mxu0 %v2368_v16  ;;  %v2349_v29 = vld [vmem:[%s3367_s2 + $0x110] sm:$0xf0]  ;;  %v625_v48 = vrot.slane %v2984_v45, 1 }
 0x203   : > { %v921_v54 = vpop.f32.mrf.mxu0  ;;  %v990_v55 = vadd.f32 %v976_v38, %v962_v36  ;;  %v949_v56 = vpop.f32.mrf.mxu1  ;;  %v2352_v30 = vor.u32 %v2597_v28, %v2349_v29  ;;  %v611_v36 = vadd.f32 %v2950_v1, %v2986_v46  ;;  %v2630_v28 = vld [vmem:[%s3367_s2 + $0x1ec] sm:$0xf] }
 0x204   : > { %v1011_v61 = vrot.slane %v949_v56, 1  ;;  %1324 = vmatpush.bf16.msrb.mxu2 %v2408_v58 }
 0x205   : > { %v997_v60 = vadd.f32 %v990_v55, %v921_v54  ;;  %v639_v54 = vadd.f32 %v625_v48, %v611_v36 }
 0x206   : > { %1271 = vmatpush.bf16.msrb.mxu0 %v2352_v30  ;;  %v2529_v30 = vld [vmem:[%s3367_s2 + $0x1f8] sm:$0xf0] }
 0x207   : > { %v3042_v34 = vadd.f32 %v1011_v61, %v997_v60 }
 0x208   : > { %v866_v37 = vpop.f32.mrf.mxu2  ;;  %v894_v33 = vpop.f32.mrf.mxu3  ;;  %1325 = vmatpush.bf16.msrb.mxu2 %v2392_v15 }
 0x209   : > { %v963_v49 = vadd.f32 %v866_v37, %v637_v63  ;;  %v977_v3 = vrot.slane %v894_v33, 1 }
 0x20b   : > { %v923_v8 = vpop.f32.mrf.mxu0  ;;  %v991_v9 = vadd.f32 %v977_v3, %v963_v49  ;;  %v951_v10 = vpop.f32.mrf.mxu1 }
 0x20c   : > { %v1012_v19 = vrot.slane %v951_v10, 1  ;;  %1326 = vmatpush.bf16.msrb.mxu2 %v2376_v22  ;;  %v2614_v22 = vld [vmem:[%s2700_s25 + $0x68] sm:$0xff] }
 0x20d   : > { %v998_v53 = vadd.f32 %v991_v9, %v923_v8 }
 0x20f   : > { %v3080_v52 = vadd.f32 %v1012_v19, %v998_v53 }
 0x210   : > { %v868_v23 = vpop.f32.mrf.mxu2  ;;  %v896_v24 = vpop.f32.mrf.mxu3  ;;  %1327 = vmatpush.bf16.msrb.mxu2 %v2360_v47  ;;  %v2521_v47 = vld [vmem:[%s3367_s2 + $0x1f0] sm:$0xf0] }
 0x211   : > { %v964_v25 = vadd.f32 %v868_v23, %v2952_v2  ;;  %v978_v26 = vrot.slane %v896_v24, 1  ;;  %v2600_v2 = vld [vmem:[%s3367_s2 + $0x114] sm:$0xf0]  ;;  %v2615_v23 = vld [vmem:[%s2700_s25 + $0x70] sm:$0xff] }
 0x212   : > { %v2356_v41 = vor.u32 %v2600_v2, %v2355_v31  ;;  %v2616_v24 = vld [vmem:[%s2700_s25 + $0x78] sm:$0xff]  ;;  %v2532_v31 = vor.u32 %v2630_v28, %v2529_v30  ;;  %v2618_v28 = vld [vmem:[%s3367_s2 + $0x18c] sm:$0xf] }
 0x213   : > { %v992_v38 = vadd.f32 %v978_v26, %v964_v25  ;;  %v954_v39 = vpop.f32.mrf.mxu1  ;;  %v926_v43 = vpop.f32.mrf.mxu0  ;;  %v2527_v25 = vld [vmem:[%s3367_s2 + $0x1e8] sm:$0xf]  ;;  %v2632_v26 = vld [vmem:[%s3367_s2 + $0x1f4] sm:$0xf0]  ;;  %v2481_v30 = vld [vmem:[%s3367_s2 + $0x198] sm:$0xf0] }
 0x214   : > { %v1013_v50 = vrot.slane %v954_v39, 1  ;;  %1299 = vmatpush.bf16.msrb.mxu1 %v2356_v41  ;;  %v2528_v29 = vor.u32 %v2632_v26, %v2527_v25  ;;  %v2631_v39 = vld [vmem:[%s3367_s2 + $0x1ec] sm:$0xf0]  ;;  %v2629_v41 = vld [vmem:[%s3367_s2 + $0x1e4] sm:$0xf] }
 0x215   : > { %v999_v40 = vadd.f32 %v992_v38, %v926_v43  ;;  %v2519_v38 = vld [vmem:[%s3367_s2 + $0x1e0] sm:$0xf]  ;;  %v2524_v48 = vor.u32 %v2629_v41, %v2521_v47  ;;  %v2479_v25 = vld [vmem:[%s3367_s2 + $0x188] sm:$0xf]  ;;  %v2620_v26 = vld [vmem:[%s3367_s2 + $0x194] sm:$0xf0] }
 0x216   : > { %1685 = vmatpush.bf16.msra.mxu2 %v2528_v29  ;;  %v2520_v43 = vor.u32 %v2631_v39, %v2519_v38  ;;  %v2480_v29 = vor.u32 %v2620_v26, %v2479_v25 }
 0x217   : > { %v3104_v55 = vadd.f32 %v1013_v50, %v999_v40  ;;  %v2511_v40 = vld [vmem:[%s3367_s2 + $0x1c8] sm:$0xf]  ;;  %v2628_v50 = vld [vmem:[%s3367_s2 + $0x1d4] sm:$0xf0] }
 0x218   : > { %v871_v1 = vpop.f32.mrf.mxu2  ;;  %v899_v46 = vpop.f32.mrf.mxu3  ;;  %1629 = vmatpush.bf16.msra.mxu0 %v2520_v43  ;;  %1657 = vmatpush.bf16.msra.mxu1 %v2524_v48 }
 0x219   : > { %v965_v56 = vadd.f32 %v871_v1, %v639_v54  ;;  %v979_v57 = vrot.slane %v899_v46, 1  ;;  %v2626_v54 = vld [vmem:[%s3367_s2 + $0x1cc] sm:$0xf]  ;;  %v2512_v1 = vor.u32 %v2628_v50, %v2511_v40  ;;  %v2513_v46 = vld [vmem:[%s3367_s2 + $0x1d8] sm:$0xf0] }
 0x21a   : > { %v2471_v40 = vld [vmem:[%s3367_s2 + $0x180] sm:$0xf]  ;;  %v2619_v50 = vld [vmem:[%s3367_s2 + $0x18c] sm:$0xf0] }
 0x21b   : > { %v3106_v58 = vadd.f32 %v979_v57, %v965_v56  ;;  %v3144_v2 = vpop.f32.mrf.mxu0  ;;  %v3146_v32 = vpop.f32.mrf.mxu1  ;;  %v2516_v56 = vor.u32 %v2626_v54, %v2513_v46  ;;  %1686 = vmatpush.bf16.msra.mxu2 %v2512_v1  ;;  %v2617_v54 = vld [vmem:[%s3367_s2 + $0x184] sm:$0xf]  ;;  %v2472_v1 = vor.u32 %v2619_v50, %v2471_v40  ;;  %v2473_v46 = vld [vmem:[%s3367_s2 + $0x190] sm:$0xf0] }
 0x220   : > { %v873_v59 = vpop.f32.mrf.mxu2  ;;  %v901_v60 = vpop.f32.mrf.mxu3 }
 0x228   : > { %v1079_v61 = vpop.f32.mrf.mxu2 }
 0x229   : > { %v1107_v63 = vmul.f32 0.2, %v1079_v61  ;;  %vm1099_vm4 = vcmp.gt.f32.partialorder %v1079_v61, 0.0 }
 0x22b   : > { %v1115_v33 = vsel %vm1099_vm4, %v1079_v61, %v1107_v63 }
 0x230   : > { %v1081_v37 = vpop.f32.mrf.mxu2 }
 0x231   : > { %vm1100_vm5 = vcmp.gt.f32.partialorder %v1081_v37, 0.0  ;;  %v1108_v45 = vmul.f32 0.2, %v1081_v37 }
 0x233   : > { %v1116_v49 = vsel %vm1100_vm5, %v1081_v37, %v1108_v45  ;;  %vm1815_vm5 = vsmask.f32 3328 }
 0x234   : > { %v1123_v3 = vpack.c.bf16 %v1116_v49, %v1115_v33 }
 0x236   : > { %2409 = vmatmul.msk.bf16.vlgmr.msra.gmra.mxu3 %vm445_vm3, %v1123_v3  ;;  %2413 = vmatmul.msk.bf16.vlgmr.msrb.gmra.mxu0 %vm445_vm3, %v1123_v3 }
 0x237   : > { %2417 = vmatmul.msk.bf16.vlgmr.msrb.gmra.mxu1 %vm445_vm3, %v1123_v3  ;;  %2421 = vmatmul.msk.bf16.vlgmr.msrb.gmra.mxu2 %vm445_vm3, %v1123_v3 }
 0x238   : > { %v1084_v4 = vpop.f32.mrf.mxu2  ;;  %1713 = vmatpush.bf16.msra.mxu3 %v2532_v31  ;;  %v2484_v31 = vor.u32 %v2618_v28, %v2481_v30 }
 0x239   : > { %v1109_v0 = vmul.f32 0.2, %v1084_v4  ;;  %vm1101_vm6 = vcmp.gt.f32.partialorder %v1084_v4, 0.0 }
 0x23b   : > { %v1117_v6 = vsel %vm1101_vm6, %v1084_v4, %v1109_v0  ;;  %v2503_v4 = vld [vmem:[%s3367_s2 + $0x1c0] sm:$0xf]  ;;  %v2627_v0 = vld [vmem:[%s3367_s2 + $0x1cc] sm:$0xf0]  ;;  %vm1838_vm6 = vcmask 1046528  }
 0x23c   : > { %1714 = vmatpush.bf16.msra.mxu3 %v2516_v56 }
 0x240   : > { %v1086_v44 = vpop.f32.mrf.mxu2 }
 0x241   : > { %vm1102_vm7 = vcmp.gt.f32.partialorder %v1086_v44, 0.0  ;;  %v1110_v35 = vmul.f32 0.2, %v1086_v44 }
 0x243   : > { %v1118_v7 = vsel %vm1102_vm7, %v1086_v44, %v1110_v35  ;;  %v2625_v35 = vld [vmem:[%s3367_s2 + $0x1c4] sm:$0xf] }
 0x244   : > { %v1124_v8 = vpack.c.bf16 %v1118_v7, %v1117_v6  ;;  %v2495_v7 = vld [vmem:[%s3367_s2 + $0x1a8] sm:$0xf] }
 0x246   : > { %2410 = vmatmul.msk.bf16.gmra.mxu3 %vm445_vm3, %v1124_v8  ;;  %2414 = vmatmul.msk.bf16.gmra.mxu0 %vm445_vm3, %v1124_v8 }
 0x247   : > { %2418 = vmatmul.msk.bf16.gmra.mxu1 %vm445_vm3, %v1124_v8  ;;  %2422 = vmatmul.msk.bf16.gmra.mxu2 %vm445_vm3, %v1124_v8  ;;  %v2624_v8 = vld [vmem:[%s3367_s2 + $0x1b4] sm:$0xf0] }
 0x248   : > { %v1089_v9 = vpop.f32.mrf.mxu2 }
 0x249   : > { %v1111_v10 = vmul.f32 0.2, %v1089_v9  ;;  %vm1103_vm8 = vcmp.gt.f32.partialorder %v1089_v9, 0.0 }
 0x24b   : > { %v1119_v13 = vsel %vm1103_vm8, %v1089_v9, %v1111_v10  ;;  %v2622_v9 = vld [vmem:[%s3367_s2 + $0x1ac] sm:$0xf]  ;;  %v2496_v10 = vor.u32 %v2624_v8, %v2495_v7 }
 0x24d   : > { %1687 = vmatpush.bf16.msra.mxu2 %v2496_v10 }
 0x250   : > { %v1091_v11 = vpop.f32.mrf.mxu2 }
 0x251   : > { %vm1104_vm9 = vcmp.gt.f32.partialorder %v1091_v11, 0.0  ;;  %v1112_v12 = vmul.f32 0.2, %v1091_v11  ;;  %1688 = vmatpush.bf16.msra.mxu2 %v2480_v29 }
 0x253   : > { %v1120_v14 = vsel %vm1104_vm9, %v1091_v11, %v1112_v12  ;;  %v2497_v11 = vld [vmem:[%s3367_s2 + $0x1b8] sm:$0xf0] }
 0x254   : > { %v1125_v15 = vpack.c.bf16 %v1120_v14, %v1119_v13  ;;  %v2500_v12 = vor.u32 %v2622_v9, %v2497_v11 }
 0x256   : > { %2411 = vmatmul.msk.bf16.gmra.mxu3 %vm445_vm3, %v1125_v15  ;;  %2415 = vmatmul.msk.bf16.gmra.mxu0 %vm445_vm3, %v1125_v15 }
 0x257   : > { %2419 = vmatmul.msk.bf16.gmra.mxu1 %vm445_vm3, %v1125_v15  ;;  %2423 = vmatmul.msk.bf16.gmra.mxu2 %vm445_vm3, %v1125_v15 }
 0x258   : > { %v1094_v16 = vpop.f32.mrf.mxu2  ;;  %1715 = vmatpush.bf16.msra.mxu3 %v2500_v12 }
 0x259   : > { %v1113_v17 = vmul.f32 0.2, %v1094_v16  ;;  %vm1105_vm10 = vcmp.gt.f32.partialorder %v1094_v16, 0.0 }
 0x25b   : > { %v1121_v19 = vsel %vm1105_vm10, %v1094_v16, %v1113_v17 }
 0x25c   : > { %1716 = vmatpush.bf16.msra.mxu3 %v2484_v31 }
 0x260   : > { %v1096_v18 = vpop.f32.mrf.mxu2 }
 0x261   : > { %vm1106_vm11 = vcmp.gt.f32.partialorder %v1096_v18, 0.0  ;;  %v1114_v53 = vmul.f32 0.2, %v1096_v18 }
 0x263   : > { %v1122_v51 = vsel %vm1106_vm11, %v1096_v18, %v1114_v53 }
 0x264   : > { %v1126_v62 = vpack.c.bf16 %v1122_v51, %v1121_v19 }
 0x266   : > { %2412 = vmatmul.msk.bf16.gmra.mxu3 %vm445_vm3, %v1126_v62  ;;  %2416 = vmatmul.msk.bf16.gmra.mxu0 %vm445_vm3, %v1126_v62 }
 0x267   : > { %2420 = vmatmul.msk.bf16.gmra.mxu1 %vm445_vm3, %v1126_v62  ;;  %2424 = vmatmul.msk.bf16.gmra.mxu2 %vm445_vm3, %v1126_v62  ;;  %v2487_v62 = vld [vmem:[%s3367_s2 + $0x1a0] sm:$0xf] }
 0x276   : > { %2449 = vmatmul.msk.bf16.vlgmr.msrb.gmra.mxu3 %vm279_vm0, %v2613_v21  ;;  %v2623_v21 = vld [vmem:[%s3367_s2 + $0x1ac] sm:$0xf0] }
 0x286   : > { %2450 = vmatmul.msk.bf16.gmra.mxu3 %vm279_vm0, %v2614_v22 }
 0x296   : > { %2451 = vmatmul.msk.bf16.gmra.mxu3 %vm279_vm0, %v2615_v23  ;;  %v2621_v23 = vld [vmem:[%s3367_s2 + $0x1a4] sm:$0xf] }
 0x2a6   : > { %2452 = vmatmul.msk.bf16.gmra.mxu3 %vm279_vm0, %v2616_v24 }
 0x2b3   : > { %v1273_v36 = vpop.f32.mrf.mxu0 }
 0x2b4   : > { %v1301_v42 = vpop.f32.mrf.mxu1  ;;  %v1362_v59 = vrot.slane %v1273_v36, 1 }
 0x2b9   : > { %v1245_v57 = vpop.f32.mrf.mxu3 }
 0x2ba   : > { %v1348_v60 = vadd.f32 %v1245_v57, %v2997_v5  ;;  %v1329_v61 = vpop.f32.mrf.mxu2  ;;  %v2504_v5 = vor.u32 %v2627_v0, %v2503_v4  ;;  %v2476_v57 = vor.u32 %v2617_v54, %v2473_v46 }
 0x2bb   : > { %v1275_v63 = vpop.f32.mrf.mxu0 }
 0x2bc   : > { %v3173_v37 = vadd.f32 %v1362_v59, %v1348_v60  ;;  %v1363_v33 = vrot.slane %v1275_v63, 1  ;;  %1630 = vmatpush.bf16.msra.mxu0 %v2504_v5  ;;  %v1014_v59 = vrot.slane %v3146_v32, 1 }
 0x2c1   : > { %v1247_v45 = vpop.f32.mrf.mxu3 }
 0x2c2   : > { %v1349_v49 = vadd.f32 %v1247_v45, %v3009_v20  ;;  %v2505_v20 = vld [vmem:[%s3367_s2 + $0x1d0] sm:$0xf0]  ;;  %v1330_v25 = vpop.f32.mrf.mxu2 }
 0x2c3   : > { %v1278_v3 = vpop.f32.mrf.mxu0  ;;  %v2508_v6 = vor.u32 %v2625_v35, %v2505_v20  ;;  %v1397_v54 = vrot.slane %v1330_v25, 1 }
 0x2c4   : > { %v3182_v44 = vadd.f32 %v1363_v33, %v1349_v49  ;;  %v1364_v14 = vrot.slane %v1278_v3, 1 }
 0x2c5   : > { %1658 = vmatpush.bf16.msra.mxu1 %v2508_v6 }
 0x2c9   : > { %v1250_v13 = vpop.f32.mrf.mxu3 }
 0x2ca   : > { %v1350_v15 = vadd.f32 %v1250_v13, %v3011_v27  ;;  %v2488_v27 = vor.u32 %v2623_v21, %v2487_v62  ;;  %v1333_v28 = vpop.f32.mrf.mxu2 }
 0x2cb   : > { %v1280_v16 = vpop.f32.mrf.mxu0 }
 0x2cc   : > { %v3203_v17 = vadd.f32 %v1364_v14, %v1350_v15  ;;  %v1365_v53 = vrot.slane %v1280_v16, 1  ;;  %1631 = vmatpush.bf16.msra.mxu0 %v2488_v27 }
 0x2d0   : > { %1632 = vmatpush.bf16.msra.mxu0 %v2472_v1 }
 0x2d1   : > { %v1252_v18 = vpop.f32.mrf.mxu3 }
 0x2d2   : > { %v1351_v19 = vadd.f32 %v1252_v18, %v3042_v34  ;;  %v2489_v34 = vld [vmem:[%s3367_s2 + $0x1b0] sm:$0xf0]  ;;  %v1335_v30 = vpop.f32.mrf.mxu2 }
 0x2d3   : > { %v1283_v51 = vpop.f32.mrf.mxu0  ;;  %v2492_v24 = vor.u32 %v2621_v23, %v2489_v34 }
 0x2d4   : > { %v3212_v22 = vadd.f32 %v1365_v53, %v1351_v19  ;;  %v1366_v38 = vrot.slane %v1283_v51, 1 }
 0x2d5   : > { %1659 = vmatpush.bf16.msra.mxu1 %v2492_v24  ;;  %v1302_v24 = vpop.f32.mrf.mxu1 }
 0x2d9   : > { %v1255_v36 = vpop.f32.mrf.mxu3  ;;  %1660 = vmatpush.bf16.msra.mxu1 %v2476_v57 }
 0x2da   : > { %v1352_v39 = vadd.f32 %v1255_v36, %v3080_v52  ;;  %v3273_v36 = vpop.f32.mrf.mxu2 }
 0x2db   : > { %v1285_v41 = vpop.f32.mrf.mxu0 }
 0x2dc   : > { %v3233_v42 = vadd.f32 %v1366_v38, %v1352_v39  ;;  %v1367_v43 = vrot.slane %v1285_v41, 1 }
 0x2dd   : > { %v1305_v26 = vpop.f32.mrf.mxu1 }
 0x2e1   : > { %v1257_v47 = vpop.f32.mrf.mxu3 }
 0x2e2   : > { %v1353_v48 = vadd.f32 %v1257_v47, %v3104_v55  ;;  %v1000_v55 = vadd.f32 %v3106_v58, %v3144_v2  ;;  %v3277_v39 = vpop.f32.mrf.mxu2 }
 0x2e3   : > { %v1288_v52 = vpop.f32.mrf.mxu0 }
 0x2e4   : > { %v3250_v56 = vadd.f32 %v1367_v43, %v1353_v48  ;;  %v1028_v60 = vadd.f32 %v1014_v59, %v1000_v55  ;;  %v1368_v63 = vrot.slane %v1288_v52, 1  ;;  %v1383_v52 = vadd.f32 %v3173_v37, %v1302_v24 }
 0x2e5   : > { %v1307_v29 = vpop.f32.mrf.mxu1 }
 0x2e6   : > { %v1411_v55 = vadd.f32 %v1397_v54, %v1383_v52 }
 0x2e9   : > { %v1260_v61 = vpop.f32.mrf.mxu3 }
 0x2ea   : > { %v1354_v45 = vadd.f32 %v1260_v61, %v1028_v60  ;;  %v3281_v43 = vpop.f32.mrf.mxu2 }
 0x2eb   : > { %v1290_v33 = vpop.f32.mrf.mxu0 }
 0x2ec   : > { %v3253_v49 = vadd.f32 %v1368_v63, %v1354_v45  ;;  %v1398_v63 = vrot.slane %v1333_v28, 1  ;;  %v1384_v45 = vadd.f32 %v3182_v44, %v1305_v26  ;;  %v1400_v28 = vrot.slane %v3273_v36, 1 }
 0x2ed   : > { %v3271_v31 = vpop.f32.mrf.mxu1 }
 0x2ee   : > { %v1386_v52 = vadd.f32 %v3212_v22, %v3271_v31 }
 0x2f1   : > { %v1262_v3 = vpop.f32.mrf.mxu3 }
 0x2f2   : > { %v3285_v48 = vpop.f32.mrf.mxu2  ;;  %v1412_v3 = vadd.f32 %v1398_v63, %v1384_v45 }
 0x2f5   : > { %v3275_v38 = vpop.f32.mrf.mxu1 }
 0x2f9   : > { %v1468_v4 = vpop.f32.mrf.mxu3 }
 0x2fa   : > { %v1496_v0 = vmul.f32 0.2, %v1468_v4  ;;  %vm1488_vm0 = vcmp.gt.f32.partialorder %v1468_v4, 0.0 }
 0x2fc   : > { %v1504_v2 = vsel %vm1488_vm0, %v1468_v4, %v1496_v0 }
 0x2fd   : > { %v3279_v41 = vpop.f32.mrf.mxu1 }
 0x301   : > { %v1470_v5 = vpop.f32.mrf.mxu3 }
 0x302   : > { %vm1489_vm12 = vcmp.gt.f32.partialorder %v1470_v5, 0.0  ;;  %v1497_v58 = vmul.f32 0.2, %v1470_v5 }
 0x304   : > { %v1505_v35 = vsel %vm1489_vm12, %v1470_v5, %v1497_v58 }
 0x305   : > { %v1512_v20 = vpack.c.bf16 %v1505_v35, %v1504_v2  ;;  %v3283_v47 = vpop.f32.mrf.mxu1 }
 0x307   : > { %2533 = vmatmul.msk.bf16.vlgmr.msra.gmra.mxu0 %vm445_vm3, %v1512_v20  ;;  %2537 = vmatmul.msk.bf16.vlgmr.msra.gmra.mxu1 %vm445_vm3, %v1512_v20 }
 0x308   : > { %2541 = vmatmul.msk.bf16.vlgmr.msra.gmra.mxu2 %vm445_vm3, %v1512_v20  ;;  %2545 = vmatmul.msk.bf16.vlgmr.msra.gmra.mxu3 %vm445_vm3, %v1512_v20 }
 0x309   : > { %v1473_v32 = vpop.f32.mrf.mxu3 }
 0x30a   : > { %v1498_v6 = vmul.f32 0.2, %v1473_v32  ;;  %vm1490_vm13 = vcmp.gt.f32.partialorder %v1473_v32, 0.0 }
 0x30c   : > { %v1506_v9 = vsel %vm1490_vm13, %v1473_v32, %v1498_v6  ;;  %v1817_v6 = vld [vmem:[%s3293_s15] sm:$0xf] }
 0x311   : > { %v1475_v7 = vpop.f32.mrf.mxu3 }
 0x312   : > { %vm1491_vm14 = vcmp.gt.f32.partialorder %v1475_v7, 0.0  ;;  %v1499_v8 = vmul.f32 0.2, %v1475_v7 }
 0x314   : > { %v1507_v10 = vsel %vm1491_vm14, %v1475_v7, %v1499_v8  ;;  %v1399_v7 = vrot.slane %v1335_v30, 1 }
 0x315   : > { %v1513_v11 = vpack.c.bf16 %v1507_v10, %v1506_v9 }
 0x317   : > { %2534 = vmatmul.msk.bf16.gmra.mxu0 %vm445_vm3, %v1513_v11  ;;  %2538 = vmatmul.msk.bf16.gmra.mxu1 %vm445_vm3, %v1513_v11 }
 0x318   : > { %2542 = vmatmul.msk.bf16.gmra.mxu2 %vm445_vm3, %v1513_v11  ;;  %2546 = vmatmul.msk.bf16.gmra.mxu3 %vm445_vm3, %v1513_v11 }
 0x319   : > { %v1478_v12 = vpop.f32.mrf.mxu3 }
 0x31a   : > { %v1500_v13 = vmul.f32 0.2, %v1478_v12  ;;  %vm1492_vm15 = vcmp.gt.f32.partialorder %v1478_v12, 0.0 }
 0x31c   : > { %v1508_v16 = vsel %vm1492_vm15, %v1478_v12, %v1500_v13  ;;  %v1385_v12 = vadd.f32 %v3203_v17, %v1307_v29  ;;  %v1820_v29 = vld [vmem:[%s3293_s15 + $0x4] sm:$0xf] }
 0x321   : > { %v1480_v14 = vpop.f32.mrf.mxu3 }
 0x322   : > { %vm1493_vm1 = vcmp.gt.f32.partialorder %v1480_v14, 0.0  ;;  %v1501_v15 = vmul.f32 0.2, %v1480_v14 }
 0x324   : > { %v1509_v18 = vsel %vm1493_vm1, %v1480_v14, %v1501_v15 }
 0x325   : > { %v1514_v53 = vpack.c.bf16 %v1509_v18, %v1508_v16 }
 0x327   : > { %2535 = vmatmul.msk.bf16.gmra.mxu0 %vm445_vm3, %v1514_v53  ;;  %2539 = vmatmul.msk.bf16.gmra.mxu1 %vm445_vm3, %v1514_v53 }
 0x328   : > { %2543 = vmatmul.msk.bf16.gmra.mxu2 %vm445_vm3, %v1514_v53  ;;  %2547 = vmatmul.msk.bf16.gmra.mxu3 %vm445_vm3, %v1514_v53 }
 0x329   : > { %v1483_v19 = vpop.f32.mrf.mxu3 }
 0x32a   : > { %v1502_v51 = vmul.f32 0.2, %v1483_v19  ;;  %vm1494_vm2 = vcmp.gt.f32.partialorder %v1483_v19, 0.0 }
 0x32c   : > { %v1510_v27 = vsel %vm1494_vm2, %v1483_v19, %v1502_v51  ;;  %v1413_v51 = vadd.f32 %v1399_v7, %v1385_v12  ;;  %v1823_v7 = vld [vmem:[%s3293_s15 + $0x8] sm:$0xf]  ;;  %v1387_v12 = vadd.f32 %v3233_v42, %v3275_v38 }
 0x331   : > { %v1485_v62 = vpop.f32.mrf.mxu3 }
 0x332   : > { %vm1495_vm4 = vcmp.gt.f32.partialorder %v1485_v62, 0.0  ;;  %v1503_v21 = vmul.f32 0.2, %v1485_v62 }
 0x334   : > { %v1511_v23 = vsel %vm1495_vm4, %v1485_v62, %v1503_v21 }
 0x335   : > { %v1515_v34 = vpack.c.bf16 %v1511_v23, %v1510_v27 }
 0x337   : > { %2536 = vmatmul.msk.bf16.gmra.mxu0 %vm445_vm3, %v1515_v34  ;;  %2540 = vmatmul.msk.bf16.gmra.mxu1 %vm445_vm3, %v1515_v34 }
 0x338   : > { %2544 = vmatmul.msk.bf16.gmra.mxu2 %vm445_vm3, %v1515_v34  ;;  %2548 = vmatmul.msk.bf16.gmra.mxu3 %vm445_vm3, %v1515_v34  ;;  %vm1814_vm3 = vcmask 1043456  }
 0x339   : > { %vm3295_vm7 = vmand %vm1814_vm3, %vm1815_vm5 }
 0x384   : > { %v1634_v40 = vpop.f32.mrf.mxu0  ;;  %v1662_v50 = vpop.f32.mrf.mxu1 }
 0x385   : > { %v1737_v60 = vadd.f32 %v1634_v40, %v1411_v55  ;;  %v1751_v61 = vrot.slane %v1662_v50, 1 }
 0x387   : > { %v1765_v33 = vadd.f32 %v1751_v61, %v1737_v60 }
 0x38b   : > { %v1690_v1 = vpop.f32.mrf.mxu2  ;;  %v1718_v46 = vpop.f32.mrf.mxu3 }
 0x38c   : > { %v1636_v57 = vpop.f32.mrf.mxu0  ;;  %v1664_v59 = vpop.f32.mrf.mxu1 }
 0x38d   : > { %v1738_v35 = vadd.f32 %v1636_v57, %v1412_v3  ;;  %v1752_v44 = vrot.slane %v1664_v59, 1 }
 0x38f   : > { %v1766_v15 = vadd.f32 %v1752_v44, %v1738_v35  ;;  %v1401_v44 = vrot.slane %v3277_v39, 1 }
 0x391   : > { %v1415_v42 = vadd.f32 %v1401_v44, %v1387_v12 }
 0x393   : > { %v1691_v4 = vpop.f32.mrf.mxu2  ;;  %v1719_v0 = vpop.f32.mrf.mxu3 }
 0x394   : > { %v1772_v5 = vadd.f32 %v1765_v33, %v1691_v4  ;;  %v1786_v37 = vrot.slane %v1719_v0, 1  ;;  %v1639_v58 = vpop.f32.mrf.mxu0  ;;  %v1667_v2 = vpop.f32.mrf.mxu1  ;;  %v1414_v33 = vadd.f32 %v1400_v28, %v1386_v52 }
 0x395   : > { %v1739_v17 = vadd.f32 %v1639_v58, %v1413_v51  ;;  %v1753_v25 = vrot.slane %v1667_v2, 1 }
 0x396   : > { %v1800_v20 = vadd.f32 %v1786_v37, %v1772_v5 }
 0x397   : > { %v1767_v59 = vadd.f32 %v1753_v25, %v1739_v17 }
 0x398   : > { %v1807_v8 = vpack.c.bf16 %v1800_v20, %v1800_v20  ;;  %v1839_v9 = vsel %vm1838_vm6, %v1800_v20, 0.0  ;;  %v1896_v10 = vmul.f32 %v1800_v20, %v1800_v20 }
 0x399   : > { %v1840_v11 = vrot.slane %v1839_v9, 4 }
 0x39a   : > { %v1818_v13 = vsel %vm3295_vm7, %v1807_v8, %v1817_v6  ;;  %v1903_v14 = vsel %vm1838_vm6, %v1896_v10, 0.0 }
 0x39b   : > { %1819 = vst [vmem:[%s3293_s15] sm:$0xf] %v1818_v13  ;;  %v1841_v16 = vadd.f32 %v1840_v11, %v1839_v9  ;;  %v1904_v18 = vrot.slane %v1903_v14, 4  ;;  %v1694_v53 = vpop.f32.mrf.mxu2  ;;  %v1722_v19 = vpop.f32.mrf.mxu3 }
 0x39c   : > { %v1773_v62 = vadd.f32 %v1766_v15, %v1694_v53  ;;  %v1787_v21 = vrot.slane %v1722_v19, 1  ;;  %v1641_v27 = vpop.f32.mrf.mxu0  ;;  %v1669_v23 = vpop.f32.mrf.mxu1 }
 0x39d   : > { %v1905_v34 = vadd.f32 %v1904_v18, %v1903_v14  ;;  %v1842_v24 = vrot.slane %v1841_v16, 2  ;;  %v1740_v58 = vadd.f32 %v1641_v27, %v1414_v33  ;;  %v1754_v2 = vrot.slane %v1669_v23, 1 }
 0x39e   : > { %v1801_v26 = vadd.f32 %v1787_v21, %v1773_v62  ;;  %v1388_v33 = vadd.f32 %v3250_v56, %v3279_v41 }
 0x39f   : > { %v1906_v30 = vrot.slane %v1905_v34, 2  ;;  %v1843_v46 = vadd.f32 %v1842_v24, %v1841_v16  ;;  %v1768_v53 = vadd.f32 %v1754_v2, %v1740_v58 }
 0x3a0   : > { %v1808_v40 = vpack.c.bf16 %v1801_v26, %v1801_v26  ;;  %v1846_v50 = vsel %vm1838_vm6, %v1801_v26, 0.0  ;;  %v1897_v54 = vmul.f32 %v1801_v26, %v1801_v26 }
 0x3a1   : > { %v1847_v1 = vrot.slane %v1846_v50, 4  ;;  %v1907_v45 = vadd.f32 %v1906_v30, %v1905_v34  ;;  %v1844_v37 = vrot.slane %v1843_v46, 1 }
 0x3a2   : > { %v1821_v55 = vsel %vm3295_vm7, %v1808_v40, %v1820_v29  ;;  %v1910_v57 = vsel %vm1838_vm6, %v1897_v54, 0.0 }
 0x3a3   : > { %1822 = vst [vmem:[%s3293_s15 + $0x4] sm:$0xf] %v1821_v55  ;;  %v1848_v60 = vadd.f32 %v1847_v1, %v1846_v50  ;;  %v1911_v36 = vrot.slane %v1910_v57, 4  ;;  %v1696_v61 = vpop.f32.mrf.mxu2  ;;  %v1724_v63 = vpop.f32.mrf.mxu3  ;;  %v1908_v8 = vrot.slane %v1907_v45, 1  ;;  %v1845_v16 = vadd.f32 %v1844_v37, %v1843_v46  ;;  %v1826_v55 = vld [vmem:[%s3293_s15 + $0xc] sm:$0xf] }
 0x3a4   : > { %v1774_v3 = vadd.f32 %v1767_v59, %v1696_v61  ;;  %v1788_v4 = vrot.slane %v1724_v63, 1  ;;  %v1644_v0 = vpop.f32.mrf.mxu0  ;;  %v1672_v22 = vpop.f32.mrf.mxu1 }
 0x3a5   : > { %v1849_v31 = vrot.slane %v1848_v60, 2  ;;  %v1912_v5 = vadd.f32 %v1911_v36, %v1910_v57  ;;  %v1909_v34 = vadd.f32 %v1908_v8, %v1907_v45  ;;  %v1741_v40 = vadd.f32 %v1644_v0, %v1415_v42 }
 0x3a6   : > { %v1802_v35 = vadd.f32 %v1788_v4, %v1774_v3  ;;  %v1755_v50 = vrot.slane %v1672_v22, 1  ;;  %v1402_v57 = vrot.slane %v3281_v43, 1 }
 0x3a7   : > { %v1850_v20 = vadd.f32 %v1849_v31, %v1848_v60  ;;  %v1913_v6 = vrot.slane %v1912_v5, 2 }
 0x3a8   : > { %v1809_v9 = vpack.c.bf16 %v1802_v35, %v1802_v35  ;;  %v1853_v10 = vsel %vm1838_vm6, %v1802_v35, 0.0  ;;  %v1898_v11 = vmul.f32 %v1802_v35, %v1802_v35  ;;  %v1769_v0 = vadd.f32 %v1755_v50, %v1741_v40 }
 0x3a9   : > { %v1851_v13 = vrot.slane %v1850_v20, 1  ;;  %v1914_v14 = vadd.f32 %v1913_v6, %v1912_v5  ;;  %v1854_v15 = vrot.slane %v1853_v10, 4  ;;  %v1416_v2 = vadd.f32 %v1402_v57, %v1388_v33 }
 0x3aa   : > { %v1824_v18 = vsel %vm3295_vm7, %v1809_v9, %v1823_v7  ;;  %v1917_v39 = vsel %vm1838_vm6, %v1898_v11, 0.0 }
 0x3ab   : > { %v1852_v19 = vadd.f32 %v1851_v13, %v1850_v20  ;;  %v1915_v51 = vrot.slane %v1914_v14, 1  ;;  %1825 = vst [vmem:[%s3293_s15 + $0x8] sm:$0xf] %v1824_v18  ;;  %v1855_v62 = vadd.f32 %v1854_v15, %v1853_v10  ;;  %v1918_v21 = vrot.slane %v1917_v39, 4  ;;  %v1699_v27 = vpop.f32.mrf.mxu2  ;;  %v1727_v23 = vpop.f32.mrf.mxu3  ;;  %v1829_v15 = vld [vmem:[%s3293_s15 + $0x10] sm:$0xf] }
 0x3ac   : > { %v1775_v38 = vadd.f32 %v1768_v53, %v1699_v27  ;;  %v1789_v24 = vrot.slane %v1727_v23, 1  ;;  %v1646_v17 = vpop.f32.mrf.mxu0  ;;  %v1674_v25 = vpop.f32.mrf.mxu1 }
 0x3ad   : > { %v1888_v26 = vadd.f32 %v1852_v19, %v1845_v16  ;;  %v1916_v28 = vadd.f32 %v1915_v51, %v1914_v14  ;;  %v1856_v29 = vrot.slane %v1855_v62, 2  ;;  %v1919_v30 = vadd.f32 %v1918_v21, %v1917_v39 }
 0x3ae   : > { %v1803_v54 = vadd.f32 %v1789_v24, %v1775_v38  ;;  %v1742_v9 = vadd.f32 %v1646_v17, %v1416_v2  ;;  %v1756_v10 = vrot.slane %v1674_v25, 1  ;;  %v1403_v16 = vrot.slane %v3285_v48, 1 }
 0x3af   : > { %v1952_v52 = vadd.f32 %v1916_v28, %v1909_v34  ;;  %v1857_v1 = vadd.f32 %v1856_v29, %v1855_v62  ;;  %v1920_v46 = vrot.slane %v1919_v30, 2  ;;  %v1389_v21 = vadd.f32 %v3253_v49, %v3283_v47 }
 0x3b0   : > { %v1810_v59 = vpack.c.bf16 %v1803_v54, %v1803_v54  ;;  %v1860_v60 = vsel %vm1838_vm6, %v1803_v54, 0.0  ;;  %v1899_v36 = vmul.f32 %v1803_v54, %v1803_v54  ;;  %v1770_v34 = vadd.f32 %v1756_v10, %v1742_v9 }
 0x3b1   : > { %v1858_v61 = vrot.slane %v1857_v1, 1  ;;  %v1921_v63 = vadd.f32 %v1920_v46, %v1919_v30  ;;  %v1861_v45 = vrot.slane %v1860_v60, 4 }
 0x3b2   : > { %v1827_v3 = vsel %vm3295_vm7, %v1810_v59, %v1826_v55  ;;  %v1924_v4 = vsel %vm1838_vm6, %v1899_v36, 0.0 }
 0x3b3   : > { %v1859_v22 = vadd.f32 %v1858_v61, %v1857_v1  ;;  %v1922_v31 = vrot.slane %v1921_v63, 1  ;;  %1828 = vst [vmem:[%s3293_s15 + $0xc] sm:$0xf] %v1827_v3  ;;  %v1862_v43 = vadd.f32 %v1861_v45, %v1860_v60  ;;  %v1925_v5 = vrot.slane %v1924_v4, 4  ;;  %v1701_v37 = vpop.f32.mrf.mxu2  ;;  %v1729_v58 = vpop.f32.mrf.mxu3  ;;  %v1832_v60 = vld [vmem:[%s3293_s15 + $0x14] sm:$0xf] }
 0x3b4   : > { %v1776_v35 = vadd.f32 %v1769_v0, %v1701_v37  ;;  %v1790_v44 = vrot.slane %v1729_v58, 1  ;;  %v1649_v20 = vpop.f32.mrf.mxu0  ;;  %v1677_v6 = vpop.f32.mrf.mxu1 }
 0x3b5   : > { %v1889_v56 = vadd.f32 %v1888_v26, %v1859_v22  ;;  %v1923_v41 = vadd.f32 %v1922_v31, %v1921_v63  ;;  %v1863_v7 = vrot.slane %v1862_v43, 2  ;;  %v1926_v8 = vadd.f32 %v1925_v5, %v1924_v4 }
 0x3b6   : > { %v1804_v11 = vadd.f32 %v1790_v44, %v1776_v35  ;;  %v1417_v26 = vadd.f32 %v1403_v16, %v1389_v21  ;;  %v1757_v1 = vrot.slane %v1677_v6, 1 }
 0x3b7   : > { %v1953_v12 = vadd.f32 %v1952_v52, %v1923_v41  ;;  %v1864_v13 = vadd.f32 %v1863_v7, %v1862_v43  ;;  %v1927_v14 = vrot.slane %v1926_v8, 2 }
 0x3b8   : > { %v1811_v18 = vpack.c.bf16 %v1804_v11, %v1804_v11  ;;  %v1867_v39 = vsel %vm1838_vm6, %v1804_v11, 0.0  ;;  %v1900_v53 = vmul.f32 %v1804_v11, %v1804_v11  ;;  %v1743_v52 = vadd.f32 %v1649_v20, %v1417_v26  ;;  %v1835_v11 = vld [vmem:[%s3293_s15 + $0x18] sm:$0xf] }
 0x3b9   : > { %v1865_v19 = vrot.slane %v1864_v13, 1  ;;  %v1928_v51 = vadd.f32 %v1927_v14, %v1926_v8  ;;  %v1868_v62 = vrot.slane %v1867_v39, 4 }
 0x3ba   : > { %v1830_v27 = vsel %vm3295_vm7, %v1811_v18, %v1829_v15  ;;  %v1931_v23 = vsel %vm1838_vm6, %v1900_v53, 0.0  ;;  %v1771_v22 = vadd.f32 %v1757_v1, %v1743_v52 }
 0x3bb   : > { %v1866_v42 = vadd.f32 %v1865_v19, %v1864_v13  ;;  %v1929_v38 = vrot.slane %v1928_v51, 1  ;;  %1831 = vst [vmem:[%s3293_s15 + $0x10] sm:$0xf] %v1830_v27  ;;  %v1869_v48 = vadd.f32 %v1868_v62, %v1867_v39  ;;  %v1932_v24 = vrot.slane %v1931_v23, 4  ;;  %v1704_v17 = vpop.f32.mrf.mxu2  ;;  %v1732_v25 = vpop.f32.mrf.mxu3 }
 0x3bc   : > { %v1777_v28 = vadd.f32 %v1770_v34, %v1704_v17  ;;  %v1791_v29 = vrot.slane %v1732_v25, 1  ;;  %v1651_v30 = vpop.f32.mrf.mxu0  ;;  %v1679_v40 = vpop.f32.mrf.mxu1 }
 0x3bd   : > { %v1890_v49 = vadd.f32 %v1889_v56, %v1866_v42  ;;  %v1930_v47 = vadd.f32 %v1929_v38, %v1928_v51  ;;  %v1870_v50 = vrot.slane %v1869_v48, 2  ;;  %v1933_v54 = vadd.f32 %v1932_v24, %v1931_v23 }
 0x3be   : > { %v1805_v46 = vadd.f32 %v1791_v29, %v1777_v28 }
 0x3bf   : > { %v1954_v55 = vadd.f32 %v1953_v12, %v1930_v47  ;;  %v1871_v57 = vadd.f32 %v1870_v50, %v1869_v48  ;;  %v1934_v59 = vrot.slane %v1933_v54, 2 }
 0x3c0   : > { %v1812_v36 = vpack.c.bf16 %v1805_v46, %v1805_v46  ;;  %v1874_v61 = vsel %vm1838_vm6, %v1805_v46, 0.0  ;;  %v1901_v63 = vmul.f32 %v1805_v46, %v1805_v46 }
 0x3c1   : > { %v1872_v45 = vrot.slane %v1871_v57, 1  ;;  %v1935_v33 = vadd.f32 %v1934_v59, %v1933_v54  ;;  %v1875_v3 = vrot.slane %v1874_v61, 4 }
 0x3c2   : > { %v1833_v4 = vsel %vm3295_vm7, %v1812_v36, %v1832_v60  ;;  %v1938_v0 = vsel %vm1838_vm6, %v1901_v63, 0.0 }
 0x3c3   : > { %v1873_v31 = vadd.f32 %v1872_v45, %v1871_v57  ;;  %v1936_v43 = vrot.slane %v1935_v33, 1  ;;  %1834 = vst [vmem:[%s3293_s15 + $0x14] sm:$0xf] %v1833_v4  ;;  %v1876_v5 = vadd.f32 %v1875_v3, %v1874_v61  ;;  %v1939_v37 = vrot.slane %v1938_v0, 4  ;;  %v1706_v58 = vpop.f32.mrf.mxu2  ;;  %v1734_v2 = vpop.f32.mrf.mxu3 }
 0x3c4   : > { %v1778_v35 = vadd.f32 %v1771_v22, %v1706_v58  ;;  %v1792_v44 = vrot.slane %v1734_v2, 1 }
 0x3c5   : > { %v1891_v20 = vadd.f32 %v1890_v49, %v1873_v31  ;;  %v1937_v6 = vadd.f32 %v1936_v43, %v1935_v33  ;;  %v1877_v56 = vrot.slane %v1876_v5, 2  ;;  %v1940_v41 = vadd.f32 %v1939_v37, %v1938_v0 }
 0x3c6   : > { %v1806_v7 = vadd.f32 %v1792_v44, %v1778_v35 }
 0x3c7   : > { %v1955_v8 = vadd.f32 %v1954_v55, %v1937_v6  ;;  %v1878_v9 = vadd.f32 %v1877_v56, %v1876_v5  ;;  %v1941_v10 = vrot.slane %v1940_v41, 2 }
 0x3c8   : > { %v1813_v12 = vpack.c.bf16 %v1806_v7, %v1806_v7  ;;  %v1881_v13 = vsel %vm1838_vm6, %v1806_v7, 0.0  ;;  %v1902_v14 = vmul.f32 %v1806_v7, %v1806_v7 }
 0x3c9   : > { %v1879_v15 = vrot.slane %v1878_v9, 1  ;;  %v1942_v16 = vadd.f32 %v1941_v10, %v1940_v41  ;;  %v1882_v18 = vrot.slane %v1881_v13, 4 }
 0x3ca   : > { %v1836_v39 = vsel %vm3295_vm7, %v1813_v12, %v1835_v11  ;;  %v1945_v53 = vsel %vm1838_vm6, %v1902_v14, 0.0 }
 0x3cb   : > { %v1880_v19 = vadd.f32 %v1879_v15, %v1878_v9  ;;  %v1943_v51 = vrot.slane %v1942_v16, 1  ;;  %1837 = vst [vmem:[%s3293_s15 + $0x18] sm:$0xf] %v1836_v39  ;;  %v1883_v62 = vadd.f32 %v1882_v18, %v1881_v13  ;;  %v1946_v21 = vrot.slane %v1945_v53, 4 }
 0x3cd   : > { %v1892_v27 = vadd.f32 %v1891_v20, %v1880_v19  ;;  %v1944_v23 = vadd.f32 %v1943_v51, %v1942_v16  ;;  %v1884_v34 = vrot.slane %v1883_v62, 2  ;;  %v1947_v42 = vadd.f32 %v1946_v21, %v1945_v53 }
 0x3cf   : > { %v1956_v38 = vadd.f32 %v1955_v8, %v1944_v23  ;;  %v1885_v48 = vadd.f32 %v1884_v34, %v1883_v62  ;;  %v1948_v24 = vrot.slane %v1947_v42, 2 }
 0x3d1   : > { %v1886_v17 = vrot.slane %v1885_v48, 1  ;;  %v1949_v25 = vadd.f32 %v1948_v24, %v1947_v42 }
 0x3d3   : > { %v1887_v32 = vadd.f32 %v1886_v17, %v1885_v48  ;;  %v1950_v26 = vrot.slane %v1949_v25, 1 }
 0x3d5   : > { %v1893_v28 = vadd.f32 %v1892_v27, %v1887_v32  ;;  %v1951_v29 = vadd.f32 %v1950_v26, %v1949_v25 }
 0x3d7   : > { %1895 = vst [vmem:[%s238_s20] sm:$0x1] %v1893_v28  ;;  %v1957_v30 = vadd.f32 %v1956_v38, %v1951_v29 }
 0x3d9   : > { %1959 = vst [vmem:[%s241_s23] sm:$0x1] %v1957_v30 }
 0x3da PF: > { %s16_s18 = sadd.s32 1, %s2648_s18  }
 0x3db   : > { %p13_p4 = scmp.ge.s32.totalorder %s16_s18, 4  }
 0x3dd   :  { %15 = sbr.rel (!%p13_p4) target bundleno = 1 (0x1), region = 92 }

</bundles_post_ra>
